<compile_context>
chip_gen: v6e
topology: v6e:2x2x1
jax: 0.10.0
libtpu: 0.0.40
codegen_flags: <defaults>
</compile_context>

<pallas_src>
import math
from functools import partial

import jax
import jax.numpy as jnp
from jax import lax
from jax.experimental import pallas as pl
from jax.experimental.pallas import tpu as pltpu


def to_order(degree: int) -> int:
    return 2 * degree + 1


_INV_SQRT2 = 1.0 / math.sqrt(2.0)
_NT = (((1,), (1,)), ((), ()))     # dot_general dims: (M, K) x (N, K) -> (M, N)  (q @ k^T form)


def _gelu_exact(h):
    # torch.nn.GELU() default == exact erf-based GELU.
    return 0.5 * h * (1.0 + lax.erf(h * _INV_SQRT2))


def _gelu_tanh(h):
    return jax.nn.gelu(h, approximate=True)


def _round_up(n, m):
    return ((n + m - 1) // m) * m


# -----------------------------------------------------------------------------
# Fused kernel: radial MLP + per-edge contraction, lane-major compute over row-major inputs.
# -----------------------------------------------------------------------------
def _fused_conv_kernel(edges_ref, feats_ref, basis_ref,
                       w1_ref, b1_ref, w2_ref, b2_ref, w3_ref, sf_ref, sb_ref,
                       out_ref, *,
                       mi, mo, d_in, d_out, nf, lane_chunk, num_chunks, approximate_gelu):
    f32 = jnp.float32
    ndo = nf * d_out
    cb = d_in * ndo
    gelu = _gelu_tanh if approximate_gelu else _gelu_exact

    w1 = w1_ref[...]
    b1 = b1_ref[...]
    w2 = w2_ref[...]
    b2 = b2_ref[...]
    w3 = w3_ref[...]           # this key's SplitLinear rows, (m, f, o)-ordered, zero-padded to 8k rows
    sf = sf_ref[...]           # feats transpose/permute selector
    sb = sb_ref[...]           # basis transpose selector

    # Static loop over lane chunks of the (large) edge tile: the HBM block stays big (amortises the
    # per-grid-step overhead) while the live vreg working set stays per-chunk sized (no spill storm).
    for c in range(num_chunks):
        lo, hi = c * lane_chunk, (c + 1) * lane_chunk

        # ---- radial MLP, lane-major (edges on lanes).  The row-major -> lane-major transpose of the
        #      edge chunk is folded into the NT-form matmul: (mid, K) x (LC, K) -> (mid, LC).
        x = edges_ref[lo:hi, :].astype(f32)                                       # (LC, edge_dim)
        h = lax.dot_general(w1, x, _NT, preferred_element_type=f32) + b1
        h = gelu(h)
        h = jnp.dot(w2, h, preferred_element_type=f32) + b2
        h = gelu(h)
        w = jnp.dot(w3, h, preferred_element_type=f32)                            # (size_pad, LC)

        feats_c = feats_ref[lo:hi, :].astype(f32)                                 # (LC, mi*d_in)

        if ndo == 1:
            # (di, 0)-type keys: nf == d_out == 1.
            if cb == 1:
                # basis is a per-edge scalar: fold it in row-major (lane broadcast), then transpose.
                prod = feats_c * basis_ref[lo:hi, :].astype(f32)                  # (LC, mi)
                tmp = lax.dot_general(sf, prod, _NT, preferred_element_type=f32)  # (rf, LC), rows (m)
            else:
                fT = lax.dot_general(sf, feats_c, _NT, preferred_element_type=f32)        # rows (i, m)
                bT = lax.dot_general(sb, basis_ref[lo:hi, :].astype(f32), _NT,
                                     preferred_element_type=f32)                           # rows (i)
                tmp = None
                for i in range(d_in):
                    term = fT[i * mi:(i + 1) * mi, :] * bT[i:i + 1, :]            # (mi, LC) block FMA
                    tmp = term if tmp is None else tmp + term
            # out[o] = sum_m w[(m, o)] * tmp[m]  -- blocked over o: (mo, LC) FMAs, one full store.
            acc = None
            for m in range(mi):
                term = w[m * mo:(m + 1) * mo, :] * tmp[m:m + 1, :]                # (mo, LC)
                acc = term if acc is None else acc + term
            out_ref[:, lo:hi] = acc.astype(out_ref.dtype)
        else:
            fT = lax.dot_general(sf, feats_c, _NT, preferred_element_type=f32)    # rows (m, i)
            bT = lax.dot_general(sb, basis_ref[lo:hi, :].astype(f32), _NT,
                                 preferred_element_type=f32)                       # rows (i, f, d)
            # stage 1: tmp[(m, f, d)] = sum_i feats[m, i] * basis[i, (f, d)]  -- (ndo, LC) blocks.
            tmp_blocks = []
            for m in range(mi):
                acc = None
                for i in range(d_in):
                    r = m * d_in + i
                    term = fT[r:r + 1, :] * bT[i * ndo:(i + 1) * ndo, :]          # (ndo, LC)
                    acc = term if acc is None else acc + term
                tmp_blocks.append(acc)
            # stage 2: out[(o, d)] = sum_{m, f} w[(m, f, o)] * tmp[(m, f, d)] -- (d_out, LC) blocks,
            # one lane-dense store per o (lanes are a 128-multiple -> unmasked vst on the lane axis).
            for o in range(mo):
                acc = None
                for m in range(mi):
                    tm = tmp_blocks[m]
                    for f in range(nf):
                        r = (m * nf + f) * mo + o
                        term = w[r:r + 1, :] * tm[f * d_out:(f + 1) * d_out, :]   # (d_out, LC)
                        acc = term if acc is None else acc + term
                out_ref[o * d_out:(o + 1) * d_out, lo:hi] = acc.astype(out_ref.dtype)


# -----------------------------------------------------------------------------
# Wrapper
# -----------------------------------------------------------------------------
def _key_offset_size(dims, key):
    offset = 0
    for k in dims:
        dki, mki, dko, mko = dims[k]
        size = to_order(min(dki, dko)) * mki * mko
        if k == key:
            return offset, size
        offset += size
    raise KeyError(key)


def _choose_tile(rows, requested, lane_chunk, min_grid=2):
    req = _round_up(max(int(requested), 128), 128)
    cap = _round_up(-(-rows // min_grid), 128)      # largest tile that still yields >= min_grid steps
    tile = max(128, min(req, cap))
    lc = _round_up(max(128, min(int(lane_chunk), tile)), 128)
    tile = _round_up(tile, lc)
    return tile, lc


def _selector(c, perm=None):
    """(round_up(c, 8), c) f32 matrix S with S[r, perm[r]] = 1 — MXU-friendly transpose/permute."""
    eye = jnp.eye(c, dtype=jnp.float32)
    if perm is not None:
        eye = eye[jnp.asarray(perm, dtype=jnp.int32)]
    pad = _round_up(c, 8) - c
    if pad:
        eye = jnp.pad(eye, ((0, pad), (0, 0)))
    return eye


def _fused_vmem_bytes(tile, lc, edge_dim, cf, cb, c_out, mid, size_pad, rf, rb):
    item = 4
    io = 2 * (edge_dim + cf + cb + c_out) * tile * item                     # double-buffered blocks
    wts = 2 * (mid * edge_dim + mid * mid + size_pad * mid + 2 * mid + rf * cf + rb * cb) * item
    live = (2 * mid + rf + rb + size_pad + 4 * c_out + 3 * max(cf, cb) + 64) * lc * item
    return io + wts + live


def fused_conv_forward(edges, feats, basis, params, dims, key, *,
                       row_tile=2048, lane_chunk=256, approximate_gelu=False):
    """edges: (..., edge_dim); feats: (..., mi, 2*di+1); basis: (..., 2*di+1, nf*(2*do+1))."""
    di, mi, do, mo = dims[key]
    d_in, d_out = to_order(di), to_order(do)
    nf = to_order(min(di, do))
    ndo = nf * d_out
    cf, cb, c_out = mi * d_in, d_in * ndo, mo * d_out
    edge_dim = edges.shape[-1]
    mid = params["w1"].shape[0]

    batch_shape = feats.shape[:3]
    rows = math.prod(batch_shape) if batch_shape else 1
    tile, lc = _choose_tile(rows, row_tile, lane_chunk)
    num_chunks = tile // lc
    grid = (pl.cdiv(rows, tile),)

    # Flat row-major views: metadata-only reshapes, no HBM copy, no padding, no transposes.
    edges2 = edges.reshape(rows, edge_dim)
    feats2 = feats.reshape(rows, cf)
    basis2 = basis.reshape(rows, cb)

    # This key's SplitLinear rows, reordered from torch's '(o i f)' to the kernel's (m, f, o) order
    # (static permutation of a tiny weight matrix), zero-padded to a sublane multiple.
    offset, size = _key_offset_size(dims, key)
    order = [(o * mi + m) * nf + f for m in range(mi) for f in range(nf) for o in range(mo)]
    w3k = params["w3"][offset:offset + size][jnp.asarray(order, dtype=jnp.int32)]
    size_pad = _round_up(size, 8)
    if size_pad != size:
        w3k = jnp.pad(w3k, ((0, size_pad - size), (0, 0)))

    # Selector matrices used to transpose (and, for (d,0)-keys, permute) feats / basis on the MXU.
    if ndo == 1 and d_in > 1:
        fperm = [m * d_in + i for i in range(d_in) for m in range(mi)]   # rows come out (i, m)-ordered
    else:
        fperm = None
    sf = _selector(cf, fperm)
    sb = _selector(cb)
    rf, rb = sf.shape[0], sb.shape[0]

    vmem_est = _fused_vmem_bytes(tile, lc, edge_dim, cf, cb, c_out, mid, size_pad, rf, rb)
    vmem_limit = int(min(40 * 2**20, max(16 * 2**20, 4 * vmem_est)))

    kern = partial(_fused_conv_kernel, mi=mi, mo=mo, d_in=d_in, d_out=d_out, nf=nf,
                   lane_chunk=lc, num_chunks=num_chunks, approximate_gelu=approximate_gelu)

    row_block = lambda c: pl.BlockSpec((tile, c), lambda i: (i, 0))
    const_block = lambda r, c: pl.BlockSpec((r, c), lambda i: (0, 0))

    outT = pl.pallas_call(
        kern,
        out_shape=jax.ShapeDtypeStruct((c_out, rows), jnp.float32),
        grid_spec=pltpu.PrefetchScalarGridSpec(
            num_scalar_prefetch=0,
            grid=grid,
            in_specs=[
                row_block(edge_dim),               # edges  (tile, edge_dim)
                row_block(cf),                     # feats  (tile, mi*d_in)
                row_block(cb),                     # basis  (tile, d_in*nf*d_out)
                const_block(mid, edge_dim),        # W1  (torch (out, in) layout)
                const_block(mid, 1),               # b1
                const_block(mid, mid),             # W2
                const_block(mid, 1),               # b2
                const_block(size_pad, mid),        # this key's SplitLinear rows, (m, f, o)-ordered
                const_block(rf, cf),               # feats selector
                const_block(rb, cb),               # basis selector
            ],
            out_specs=pl.BlockSpec((c_out, tile), lambda i: (0, i)),
        ),
        compiler_params=pltpu.CompilerParams(
            dimension_semantics=("parallel",),
            vmem_limit_bytes=vmem_limit,
        ),
    )(edges2, feats2, basis2,
      params["w1"], params["b1"][:, None], params["w2"], params["b2"][:, None],
      w3k, sf, sb)

    # Lane-major (mo*d_out, E) -> (..., mo, d_out): one small XLA transpose of the output only.
    return outT.T.reshape(*batch_shape, mo, d_out)


# -----------------------------------------------------------------------------
# Params (PyTorch layout / init) and pure-JAX reference.
# -----------------------------------------------------------------------------
def init_fused_conv_params(key, edge_dim, mid_dim, sum_splits, dtype=jnp.float32):
    ks = jax.random.split(key, 5)

    def lin_w(k, fan_in, fan_out):
        bound = 1.0 / math.sqrt(fan_in)
        return jax.random.uniform(k, (fan_out, fan_in), dtype, -bound, bound)

    def lin_b(k, fan_in, fan_out):
        bound = 1.0 / math.sqrt(fan_in)
        return jax.random.uniform(k, (fan_out,), dtype, -bound, bound)

    return {
        "w1": lin_w(ks[0], edge_dim, mid_dim), "b1": lin_b(ks[1], edge_dim, mid_dim),
        "w2": lin_w(ks[2], mid_dim, mid_dim),  "b2": lin_b(ks[3], mid_dim, mid_dim),
        "w3": lin_w(ks[4], mid_dim, sum_splits),   # SplitLinear, bias=False
    }


def reference_forward(edges, feats, basis, params, dims, key):
    hi = lax.Precision.HIGHEST
    di, mi, do, mo = dims[key]
    d_in, d_out = to_order(di), to_order(do)
    nf = to_order(min(di, do))

    x = edges.astype(jnp.float32)
    h = _gelu_exact(jnp.einsum("...i,oi->...o", x, params["w1"], precision=hi) + params["b1"])
    h = _gelu_exact(jnp.einsum("...i,oi->...o", h, params["w2"], precision=hi) + params["b2"])
    rp = jnp.einsum("...i,oi->...o", h, params["w3"], precision=hi)

    offset, size = _key_offset_size(dims, key)
    rw = rp[..., offset:offset + size].reshape(-1, mo, mi * nf)          # '(o i f)' -> (o, i*f)
    feats_f = feats.reshape(-1, mi, d_in).astype(jnp.float32)
    basis_f = basis.reshape(-1, d_in, nf * d_out).astype(jnp.float32)
    tmp = jnp.einsum("emi,eik->emk", feats_f, basis_f, precision=hi).reshape(-1, mi * nf, d_out)
    out = jnp.einsum("eoc,ecd->eod", rw, tmp, precision=hi)
    return out.reshape(*feats.shape[:3], mo, d_out)


if __name__ == "__main__":
    # FusedConv config: two fiber blocks -> SplitLinear with two splits.
    feat_dims = [((0, 8), (0, 8)), ((1, 4), (1, 4))]
    edge_dim, radial_mult = 16, 2

    dims, split_sizes = {}, []
    for (di_, mi_), (do_, mo_) in feat_dims:
        k = f"({di_},{do_})"
        dims[k] = (di_, mi_, do_, mo_)
        split_sizes.append(to_order(min(di_, do_)) * mi_ * mo_)
    mid_dim = int(edge_dim * radial_mult * len(dims))      # 64
    sum_splits = sum(split_sizes)                          # 64 + 48 = 112

    B, N = 2, 16                                           # E = B*N*N = 512 edges -> grid of 2 tiles
    rng = jax.random.PRNGKey(0)
    kp, ke, kfb = jax.random.split(rng, 3)
    params = init_fused_conv_params(kp, edge_dim, mid_dim, sum_splits)
    edges = jax.random.normal(ke, (B, N, N, edge_dim), jnp.float32)

    for idx, key_name in enumerate(dims):
        di_, mi_, do_, mo_ = dims[key_name]
        d_in, d_out, nf = to_order(di_), to_order(do_), to_order(min(di_, do_))
        kf_, kb_ = jax.random.split(jax.random.fold_in(kfb, idx))

        feats = jax.random.normal(kf_, (B, N, N, mi_, d_in), jnp.float32)
        basis = jax.random.normal(kb_, (B, N, N, d_in, nf * d_out), jnp.float32)

        fwd = jax.jit(partial(fused_conv_forward, dims=dims, key=key_name))
        out = jax.block_until_ready(fwd(edges, feats, basis, params))
        ref = reference_forward(edges, feats, basis, params, dims, key_name)

        assert out.shape == (B, N, N, mo_, d_out), (key_name, out.shape)
        err = float(jnp.max(jnp.abs(out - ref)))
        assert jnp.allclose(out, ref, atol=5e-3, rtol=5e-3), f"key {key_name}: max abs err {err}"

    print("KERNEL_OK")
</pallas_src>

<mosaic_0001>
module attributes {stable_mosaic.version = 11 : i64} {
  func.func @_fused_conv_kernel(%arg0: i32, %arg1: memref<256x16xf32, #tpu.memory_space<vmem>>, %arg2: memref<256x8xf32, #tpu.memory_space<vmem>>, %arg3: memref<256x1xf32, #tpu.memory_space<vmem>>, %arg4: memref<64x16xf32, #tpu.memory_space<vmem>>, %arg5: memref<64x1xf32, #tpu.memory_space<vmem>>, %arg6: memref<64x64xf32, #tpu.memory_space<vmem>>, %arg7: memref<64x1xf32, #tpu.memory_space<vmem>>, %arg8: memref<64x64xf32, #tpu.memory_space<vmem>>, %arg9: memref<8x8xf32, #tpu.memory_space<vmem>>, %arg10: memref<8x1xf32, #tpu.memory_space<vmem>>, %arg11: memref<8x256xf32, #tpu.memory_space<vmem>>) attributes {dimension_semantics = [#tpu.dimension_semantics<parallel>], iteration_bounds = array<i64: 2>, scalar_prefetch = 0 : i64, scratch_operands = 0 : i64, tpu.core_type = #tpu.core_type<tc>, window_params = [{transform_indices = @transform_0, window_bounds = array<i64: 256, 16>}, {transform_indices = @transform_1, window_bounds = array<i64: 256, 8>}, {transform_indices = @transform_2, window_bounds = array<i64: 256, 1>}, {pipeline_mode = #tpu.pipeline_mode<synchronous>, transform_indices = @transform_3, window_bounds = array<i64: 64, 16>}, {pipeline_mode = #tpu.pipeline_mode<synchronous>, transform_indices = @transform_4, window_bounds = array<i64: 64, 1>}, {pipeline_mode = #tpu.pipeline_mode<synchronous>, transform_indices = @transform_5, window_bounds = array<i64: 64, 64>}, {pipeline_mode = #tpu.pipeline_mode<synchronous>, transform_indices = @transform_6, window_bounds = array<i64: 64, 1>}, {pipeline_mode = #tpu.pipeline_mode<synchronous>, transform_indices = @transform_7, window_bounds = array<i64: 64, 64>}, {pipeline_mode = #tpu.pipeline_mode<synchronous>, transform_indices = @transform_8, window_bounds = array<i64: 8, 8>}, {pipeline_mode = #tpu.pipeline_mode<synchronous>, transform_indices = @transform_9, window_bounds = array<i64: 8, 1>}, {transform_indices = @transform_10, window_bounds = array<i64: 8, 256>}]} {
    %c0 = arith.constant 0 : index
    %c0_0 = arith.constant 0 : index
    %0 = vector.load %arg4[%c0, %c0_0] : memref<64x16xf32, #tpu.memory_space<vmem>>, vector<64x16xf32>
    %c0_1 = arith.constant 0 : index
    %c0_2 = arith.constant 0 : index
    %1 = vector.load %arg5[%c0_1, %c0_2] : memref<64x1xf32, #tpu.memory_space<vmem>>, vector<64x1xf32>
    %c0_3 = arith.constant 0 : index
    %c0_4 = arith.constant 0 : index
    %2 = vector.load %arg6[%c0_3, %c0_4] : memref<64x64xf32, #tpu.memory_space<vmem>>, vector<64x64xf32>
    %c0_5 = arith.constant 0 : index
    %c0_6 = arith.constant 0 : index
    %3 = vector.load %arg7[%c0_5, %c0_6] : memref<64x1xf32, #tpu.memory_space<vmem>>, vector<64x1xf32>
    %c0_7 = arith.constant 0 : index
    %c0_8 = arith.constant 0 : index
    %4 = vector.load %arg8[%c0_7, %c0_8] : memref<64x64xf32, #tpu.memory_space<vmem>>, vector<64x64xf32>
    %c0_9 = arith.constant 0 : index
    %c0_10 = arith.constant 0 : index
    %5 = vector.load %arg9[%c0_9, %c0_10] : memref<8x8xf32, #tpu.memory_space<vmem>>, vector<8x8xf32>
    %c0_11 = arith.constant 0 : index
    %c0_12 = arith.constant 0 : index
    %6 = vector.load %arg1[%c0_11, %c0_12] : memref<256x16xf32, #tpu.memory_space<vmem>>, vector<256x16xf32>
    %cst = arith.constant dense<0.000000e+00> : vector<64x256xf32>
    %7 = tpu.matmul %0, %6, %cst {dimension_numbers = #tpu.dot_dimension_numbers<[1], [1], [0], [0], [0, 0, 1, 0], [], []>} : vector<64x16xf32>, vector<256x16xf32>, vector<64x256xf32> -> vector<64x256xf32>
    %8 = vector.broadcast %1 : vector<64x1xf32> to vector<64x256xf32>
    %9 = arith.addf %7, %8 : vector<64x256xf32>
    %cst_13 = arith.constant 5.000000e-01 : f32
    %10 = vector.broadcast %cst_13 : f32 to vector<64x256xf32>
    %11 = arith.mulf %10, %9 : vector<64x256xf32>
    %cst_14 = arith.constant 0.707106769 : f32
    %12 = vector.broadcast %cst_14 : f32 to vector<64x256xf32>
    %13 = arith.mulf %9, %12 : vector<64x256xf32>
    %14 = math.erf %13 : vector<64x256xf32>
    %cst_15 = arith.constant 1.000000e+00 : f32
    %15 = vector.broadcast %cst_15 : f32 to vector<64x256xf32>
    %16 = arith.addf %15, %14 : vector<64x256xf32>
    %17 = arith.mulf %11, %16 : vector<64x256xf32>
    %cst_16 = arith.constant dense<0.000000e+00> : vector<64x256xf32>
    %18 = tpu.matmul %2, %17, %cst_16 {dimension_numbers = #tpu.dot_dimension_numbers<[1], [0], [0], [1], [0, 0, 1, 1], [], []>} : vector<64x64xf32>, vector<64x256xf32>, vector<64x256xf32> -> vector<64x256xf32>
    %19 = vector.broadcast %3 : vector<64x1xf32> to vector<64x256xf32>
    %20 = arith.addf %18, %19 : vector<64x256xf32>
    %cst_17 = arith.constant 5.000000e-01 : f32
    %21 = vector.broadcast %cst_17 : f32 to vector<64x256xf32>
    %22 = arith.mulf %21, %20 : vector<64x256xf32>
    %cst_18 = arith.constant 0.707106769 : f32
    %23 = vector.broadcast %cst_18 : f32 to vector<64x256xf32>
    %24 = arith.mulf %20, %23 : vector<64x256xf32>
    %25 = math.erf %24 : vector<64x256xf32>
    %cst_19 = arith.constant 1.000000e+00 : f32
    %26 = vector.broadcast %cst_19 : f32 to vector<64x256xf32>
    %27 = arith.addf %26, %25 : vector<64x256xf32>
    %28 = arith.mulf %22, %27 : vector<64x256xf32>
    %cst_20 = arith.constant dense<0.000000e+00> : vector<64x256xf32>
    %29 = tpu.matmul %4, %28, %cst_20 {dimension_numbers = #tpu.dot_dimension_numbers<[1], [0], [0], [1], [0, 0, 1, 1], [], []>} : vector<64x64xf32>, vector<64x256xf32>, vector<64x256xf32> -> vector<64x256xf32>
    %c0_21 = arith.constant 0 : index
    %c0_22 = arith.constant 0 : index
    %30 = vector.load %arg2[%c0_21, %c0_22] : memref<256x8xf32, #tpu.memory_space<vmem>>, vector<256x8xf32>
    %c0_23 = arith.constant 0 : index
    %c0_24 = arith.constant 0 : index
    %31 = vector.load %arg3[%c0_23, %c0_24] : memref<256x1xf32, #tpu.memory_space<vmem>>, vector<256x1xf32>
    %32 = vector.broadcast %31 : vector<256x1xf32> to vector<256x8xf32>
    %33 = arith.mulf %30, %32 : vector<256x8xf32>
    %cst_25 = arith.constant dense<0.000000e+00> : vector<8x256xf32>
    %34 = tpu.matmul %5, %33, %cst_25 {dimension_numbers = #tpu.dot_dimension_numbers<[1], [1], [0], [0], [0, 0, 1, 0], [], []>} : vector<8x8xf32>, vector<256x8xf32>, vector<8x256xf32> -> vector<8x256xf32>
    %35 = vector.extract_strided_slice %29 {offsets = [0, 0], sizes = [8, 256], strides = [1, 1]} : vector<64x256xf32> to vector<8x256xf32>
    %36 = vector.extract_strided_slice %34 {offsets = [0, 0], sizes = [1, 256], strides = [1, 1]} : vector<8x256xf32> to vector<1x256xf32>
    %37 = vector.broadcast %36 : vector<1x256xf32> to vector<8x256xf32>
    %38 = arith.mulf %35, %37 : vector<8x256xf32>
    %39 = vector.extract_strided_slice %29 {offsets = [8, 0], sizes = [8, 256], strides = [1, 1]} : vector<64x256xf32> to vector<8x256xf32>
    %40 = vector.extract_strided_slice %34 {offsets = [1, 0], sizes = [1, 256], strides = [1, 1]} : vector<8x256xf32> to vector<1x256xf32>
    %41 = vector.broadcast %40 : vector<1x256xf32> to vector<8x256xf32>
    %42 = arith.mulf %39, %41 : vector<8x256xf32>
    %43 = arith.addf %38, %42 : vector<8x256xf32>
    %44 = vector.extract_strided_slice %29 {offsets = [16, 0], sizes = [8, 256], strides = [1, 1]} : vector<64x256xf32> to vector<8x256xf32>
    %45 = vector.extract_strided_slice %34 {offsets = [2, 0], sizes = [1, 256], strides = [1, 1]} : vector<8x256xf32> to vector<1x256xf32>
    %46 = vector.broadcast %45 : vector<1x256xf32> to vector<8x256xf32>
    %47 = arith.mulf %44, %46 : vector<8x256xf32>
    %48 = arith.addf %43, %47 : vector<8x256xf32>
    %49 = vector.extract_strided_slice %29 {offsets = [24, 0], sizes = [8, 256], strides = [1, 1]} : vector<64x256xf32> to vector<8x256xf32>
    %50 = vector.extract_strided_slice %34 {offsets = [3, 0], sizes = [1, 256], strides = [1, 1]} : vector<8x256xf32> to vector<1x256xf32>
    %51 = vector.broadcast %50 : vector<1x256xf32> to vector<8x256xf32>
    %52 = arith.mulf %49, %51 : vector<8x256xf32>
    %53 = arith.addf %48, %52 : vector<8x256xf32>
    %54 = vector.extract_strided_slice %29 {offsets = [32, 0], sizes = [8, 256], strides = [1, 1]} : vector<64x256xf32> to vector<8x256xf32>
    %55 = vector.extract_strided_slice %34 {offsets = [4, 0], sizes = [1, 256], strides = [1, 1]} : vector<8x256xf32> to vector<1x256xf32>
    %56 = vector.broadcast %55 : vector<1x256xf32> to vector<8x256xf32>
    %57 = arith.mulf %54, %56 : vector<8x256xf32>
    %58 = arith.addf %53, %57 : vector<8x256xf32>
    %59 = vector.extract_strided_slice %29 {offsets = [40, 0], sizes = [8, 256], strides = [1, 1]} : vector<64x256xf32> to vector<8x256xf32>
    %60 = vector.extract_strided_slice %34 {offsets = [5, 0], sizes = [1, 256], strides = [1, 1]} : vector<8x256xf32> to vector<1x256xf32>
    %61 = vector.broadcast %60 : vector<1x256xf32> to vector<8x256xf32>
    %62 = arith.mulf %59, %61 : vector<8x256xf32>
    %63 = arith.addf %58, %62 : vector<8x256xf32>
    %64 = vector.extract_strided_slice %29 {offsets = [48, 0], sizes = [8, 256], strides = [1, 1]} : vector<64x256xf32> to vector<8x256xf32>
    %65 = vector.extract_strided_slice %34 {offsets = [6, 0], sizes = [1, 256], strides = [1, 1]} : vector<8x256xf32> to vector<1x256xf32>
    %66 = vector.broadcast %65 : vector<1x256xf32> to vector<8x256xf32>
    %67 = arith.mulf %64, %66 : vector<8x256xf32>
    %68 = arith.addf %63, %67 : vector<8x256xf32>
    %69 = vector.extract_strided_slice %29 {offsets = [56, 0], sizes = [8, 256], strides = [1, 1]} : vector<64x256xf32> to vector<8x256xf32>
    %70 = vector.extract_strided_slice %34 {offsets = [7, 0], sizes = [1, 256], strides = [1, 1]} : vector<8x256xf32> to vector<1x256xf32>
    %71 = vector.broadcast %70 : vector<1x256xf32> to vector<8x256xf32>
    %72 = arith.mulf %69, %71 : vector<8x256xf32>
    %73 = arith.addf %68, %72 : vector<8x256xf32>
    %c0_26 = arith.constant 0 : index
    %c0_27 = arith.constant 0 : index
    %74 = vector.load %arg11[%c0_26, %c0_27] : memref<8x256xf32, #tpu.memory_space<vmem>>, vector<8x256xf32>
    tpu.vector_store %arg11[%c0_26, %c0_27], %73 {strides = array<i32>} : memref<8x256xf32, #tpu.memory_space<vmem>>, vector<8x256xf32>,
    return
  }
  func.func @transform_0(%arg0: i32) -> (i32, i32) {
    %c0_i32 = arith.constant 0 : i32
    %c0_i32_0 = arith.constant 0 : i32
    return %arg0, %c0_i32 : i32, i32
  }
  func.func @transform_1(%arg0: i32) -> (i32, i32) {
    %c0_i32 = arith.constant 0 : i32
    %c0_i32_0 = arith.constant 0 : i32
    return %arg0, %c0_i32 : i32, i32
  }
  func.func @transform_2(%arg0: i32) -> (i32, i32) {
    %c0_i32 = arith.constant 0 : i32
    %c0_i32_0 = arith.constant 0 : i32
    return %arg0, %c0_i32 : i32, i32
  }
  func.func @transform_3(%arg0: i32) -> (i32, i32) {
    %c0_i32 = arith.constant 0 : i32
    %c0_i32_0 = arith.constant 0 : i32
    %c0_i32_1 = arith.constant 0 : i32
    return %c0_i32, %c0_i32_0 : i32, i32
  }
  func.func @transform_4(%arg0: i32) -> (i32, i32) {
    %c0_i32 = arith.constant 0 : i32
    %c0_i32_0 = arith.constant 0 : i32
    %c0_i32_1 = arith.constant 0 : i32
    return %c0_i32, %c0_i32_0 : i32, i32
  }
  func.func @transform_5(%arg0: i32) -> (i32, i32) {
    %c0_i32 = arith.constant 0 : i32
    %c0_i32_0 = arith.constant 0 : i32
    %c0_i32_1 = arith.constant 0 : i32
    return %c0_i32, %c0_i32_0 : i32, i32
  }
  func.func @transform_6(%arg0: i32) -> (i32, i32) {
    %c0_i32 = arith.constant 0 : i32
    %c0_i32_0 = arith.constant 0 : i32
    %c0_i32_1 = arith.constant 0 : i32
    return %c0_i32, %c0_i32_0 : i32, i32
  }
  func.func @transform_7(%arg0: i32) -> (i32, i32) {
    %c0_i32 = arith.constant 0 : i32
    %c0_i32_0 = arith.constant 0 : i32
    %c0_i32_1 = arith.constant 0 : i32
    return %c0_i32, %c0_i32_0 : i32, i32
  }
  func.func @transform_8(%arg0: i32) -> (i32, i32) {
    %c0_i32 = arith.constant 0 : i32
    %c0_i32_0 = arith.constant 0 : i32
    %c0_i32_1 = arith.constant 0 : i32
    return %c0_i32, %c0_i32_0 : i32, i32
  }
  func.func @transform_9(%arg0: i32) -> (i32, i32) {
    %c0_i32 = arith.constant 0 : i32
    %c0_i32_0 = arith.constant 0 : i32
    %c0_i32_1 = arith.constant 0 : i32
    return %c0_i32, %c0_i32_0 : i32, i32
  }
  func.func @transform_10(%arg0: i32) -> (i32, i32) {
    %c0_i32 = arith.constant 0 : i32
    %c0_i32_0 = arith.constant 0 : i32
    return %c0_i32, %arg0 : i32, i32
  }
}

</mosaic_0001>

<bundles_post_ra>
// kernel: fused_conv_forward.1
= control target key start
LH: loop header
LB: loop body
LE: loop exit
PB: predicated region body
PF: predicated region fallthrough
CT: control target
= control target key end

     0   :  { %s2175_s13 = smov 0   ;;  %s2699_s0 = inlined_call_operand.vmem [shape: f32[512,16], index: 0, kind: input, shape index: {}]   ;;  %s2700_s1 = inlined_call_operand.vmem [shape: f32[512,8], index: 1, kind: input, shape index: {}]   ;;  %s2701_s2 = inlined_call_operand.vmem [shape: f32[512,1], index: 2, kind: input, shape index: {}]   ;;  %s2702_s3 = inlined_call_operand.vmem [shape: f32[64,16], index: 3, kind: input, shape index: {}]   ;;  %s2703_s4 = inlined_call_operand.vmem [shape: f32[64,1], index: 4, kind: input, shape index: {}]   ;;  %s2704_s5 = inlined_call_operand.vmem [shape: f32[64,64], index: 5, kind: input, shape index: {}]   ;;  %s2705_s6 = inlined_call_operand.vmem [shape: f32[64,1], index: 6, kind: input, shape index: {}]   ;;  %s2706_s7 = inlined_call_operand.vmem [shape: f32[64,64], index: 7, kind: input, shape index: {}]   ;;  %s2707_s8 = inlined_call_operand.vmem [shape: f32[8,8], index: 8, kind: input, shape index: {}]   ;;  %s2708_s9 = inlined_call_operand.vmem [shape: f32[8,1], index: 9, kind: input, shape index: {}]   ;;  %s2709_s10 = inlined_call_operand.vmem [shape: f32[8,512], index: 10, kind: output, shape index: {}]  }
   0x1 LB: > { %s1832_s14 = sadd.s32 4294967295, %s2116_s13   ;;  %p1836_p0 = scmp.ge.s32.totalorder %s2116_s13, 1  ;;  %s2116_s13 = sphi %s2175_s13, %s20_s13  }
   0x2   : > { %p335_p1 = scmp.lt.s32.totalorder %s2116_s13, 3 }
   0x4   : > { %p336_p2 = pnand %p1836_p0, %p335_p1 }
   0x5   : > { %s1837_s9 = sshll.u32 (!%p336_p2), %s1832_s14, 5 }
   0x6   : > { %339 = sbr.rel (%p336_p2) target bundleno = 872 (0x368), region = 60  ;;  %p384_p3 = scmp.lt.s32.totalorder (!%p336_p2), %s1837_s9, 63 }
   0xb   : > { %vm520_vm0 = vcmask 130048   ;;  %v2188_v0 = vld [vmem:[%s2702_s3] sm:$0xff]  ;;  %v422_v1 = vld [vmem:[%s2703_s4 + $0x38] sm:$0xff]  ;;  %v2118_v2 = vmov 0   ;;  %v420_v3 = vld [vmem:[%s2703_s4 + $0x28] sm:$0xff]  ;;  %s2711_s9 = smov (!%p384_p3, %s1837_s9), 63 }
   0xc   : > { %1968 = vmatprep.mubr.msk.f32.mxu0 %vm520_vm0, %v2188_v0  ;;  %2044 = vset.pattern.permute.xlu0 %v2118_v2  ;;  %v421_v4 = vld [vmem:[%s2703_s4 + $0x30] sm:$0xff]  ;;  %v419_v5 = vld [vmem:[%s2703_s4 + $0x20] sm:$0xff]  ;;  %s2204_s25 = sshll.u32 %s2711_s9, 3  ;;  %v418_v6 = vld [vmem:[%s2703_s4 + $0x18] sm:$0xff]  ;;  %vm874_vm1 = vcmask 523264   ;;  %vm1485_vm2 = vcmask 64512  }
   0xd   : > { %517 = vperm.xlu0 %2044, %v422_v1   ;;  %2045 = vset.pattern.permute.xlu1 %v2118_v2  ;;  %s2210_s28 = scalar_lea.vmem %s2699_s0, %s2204_s25  ;;  %v417_v10 = vld [vmem:[%s2703_s4 + $0x10] sm:$0xff]  ;;  %v416_v13 = vld [vmem:[%s2703_s4 + $0x8] sm:$0xff]  ;;  %v415_v14 = vld [vmem:[%s2703_s4] sm:$0xff]  ;;  %s2276_s19 = scalar_lea.vmem %s2701_s2, %s2204_s25 }
   0xe   : > { %507 = vperm.xlu1 %2045, %v420_v3   ;;  %v479_v7 = vld [vmem:[%s2210_s28 + $0xf8] sm:$0xff]  ;;  %v478_v9 = vld [vmem:[%s2210_s28 + $0xf0] sm:$0xff]  ;;  %v477_v12 = vld [vmem:[%s2210_s28 + $0xe8] sm:$0xff]  ;;  %s2560_s16 = scalar_lea.vmem %s2700_s1, %s2204_s25 }
   0xf   : > { %v463_v8 = vld [vmem:[%s2210_s28 + $0x78] sm:$0xff]  ;;  %1936 = vmatprep.subr.msk.mxu0 %vm520_vm0, %v479_v7  ;;  %v462_v11 = vld [vmem:[%s2210_s28 + $0x70] sm:$0xff]  ;;  %v461_v15 = vld [vmem:[%s2210_s28 + $0x68] sm:$0xff] }
  0x10   : > { %1937 = vmatpush3.xpose.msk.msra.mxu0 %vm520_vm0, %v463_v8  ;;  %v476_v16 = vld [vmem:[%s2210_s28 + $0xe0] sm:$0xff]  ;;  %v438_v17 = vld [vmem:[%s2705_s6 + $0x38] sm:$0xff]  ;;  %v437_v18 = vld [vmem:[%s2705_s6 + $0x30] sm:$0xff] }
  0x11   : > { %512 = vperm.xlu0 %2044, %v421_v4   ;;  %1938 = vmatprep.subr.msk.mxu0 %vm520_vm0, %v478_v9  ;;  %v460_v19 = vld [vmem:[%s2210_s28 + $0x60] sm:$0xff]  ;;  %v475_v20 = vld [vmem:[%s2210_s28 + $0xd8] sm:$0xff]  ;;  %v436_v21 = vld [vmem:[%s2705_s6 + $0x28] sm:$0xff] }
  0x12   : > { %502 = vperm.xlu1 %2045, %v419_v5   ;;  %v435_v22 = vld [vmem:[%s2705_s6 + $0x20] sm:$0xff]  ;;  %v459_v23 = vld [vmem:[%s2210_s28 + $0x58] sm:$0xff]  ;;  %v474_v24 = vld [vmem:[%s2210_s28 + $0xd0] sm:$0xff] }
  0x13   : > { %v434_v25 = vld [vmem:[%s2705_s6 + $0x18] sm:$0xff]  ;;  %v433_v26 = vld [vmem:[%s2705_s6 + $0x10] sm:$0xff]  ;;  %v473_v28 = vld [vmem:[%s2210_s28 + $0xc8] sm:$0xff] }
  0x14   : > { %1939 = vmatpush3.xpose.msk.msra.mxu0 %vm520_vm0, %v462_v11  ;;  %v458_v27 = vld [vmem:[%s2210_s28 + $0x50] sm:$0xff]  ;;  %v432_v29 = vld [vmem:[%s2705_s6 + $0x8] sm:$0xff]  ;;  %v431_v30 = vld [vmem:[%s2705_s6] sm:$0xff] }
  0x15   : > { %497 = vperm.xlu0 %2044, %v418_v6   ;;  %1940 = vmatprep.subr.msk.mxu0 %vm520_vm0, %v477_v12  ;;  %v457_v31 = vld [vmem:[%s2210_s28 + $0x48] sm:$0xff]  ;;  %v472_v32 = vld [vmem:[%s2210_s28 + $0xc0] sm:$0xff]  ;;  %v1292_v33 = vld [vmem:[%s2276_s19 + $0xf8] sm:$0xff] }
  0x16   : > { %492 = vperm.xlu1 %2045, %v417_v10   ;;  %v1276_v34 = vld [vmem:[%s2276_s19 + $0x78] sm:$0xff]  ;;  %v456_v35 = vld [vmem:[%s2210_s28 + $0x40] sm:$0xff]  ;;  %v1291_v37 = vld [vmem:[%s2276_s19 + $0xf0] sm:$0xff] }
  0x17   : > { %v471_v36 = vld [vmem:[%s2210_s28 + $0xb8] sm:$0xff]  ;;  %v1275_v38 = vld [vmem:[%s2276_s19 + $0x70] sm:$0xff]  ;;  %v1290_v41 = vld [vmem:[%s2276_s19 + $0xe8] sm:$0xff] }
  0x18   : > { %1941 = vmatpush3.xpose.msk.msra.mxu0 %vm520_vm0, %v461_v15  ;;  %v455_v39 = vld [vmem:[%s2210_s28 + $0x38] sm:$0xff]  ;;  %v470_v40 = vld [vmem:[%s2210_s28 + $0xb0] sm:$0xff]  ;;  %v1274_v42 = vld [vmem:[%s2276_s19 + $0x68] sm:$0xff] }
  0x19   : > { %487 = vperm.xlu0 %2044, %v416_v13   ;;  %1942 = vmatprep.subr.msk.mxu0 %vm520_vm0, %v476_v16  ;;  %v454_v43 = vld [vmem:[%s2210_s28 + $0x30] sm:$0xff]  ;;  %v469_v44 = vld [vmem:[%s2210_s28 + $0xa8] sm:$0xff]  ;;  %v1289_v45 = vld [vmem:[%s2276_s19 + $0xe0] sm:$0xff] }
  0x1a   : > { %482 = vperm.xlu1 %2045, %v415_v14   ;;  %v1273_v46 = vld [vmem:[%s2276_s19 + $0x60] sm:$0xff]  ;;  %v453_v47 = vld [vmem:[%s2210_s28 + $0x28] sm:$0xff]  ;;  %v1288_v49 = vld [vmem:[%s2276_s19 + $0xd8] sm:$0xff] }
  0x1b   : > { %v468_v48 = vld [vmem:[%s2210_s28 + $0xa0] sm:$0xff]  ;;  %v1272_v50 = vld [vmem:[%s2276_s19 + $0x58] sm:$0xff]  ;;  %v1287_v53 = vld [vmem:[%s2276_s19 + $0xd0] sm:$0xff] }
  0x1c   : > { %1943 = vmatpush3.xpose.msk.msra.mxu0 %vm520_vm0, %v460_v19  ;;  %v452_v51 = vld [vmem:[%s2210_s28 + $0x20] sm:$0xff]  ;;  %v467_v52 = vld [vmem:[%s2210_s28 + $0x98] sm:$0xff]  ;;  %v1271_v54 = vld [vmem:[%s2276_s19 + $0x50] sm:$0xff] }
  0x1d   : > { %871 = vperm.xlu0 %2044, %v438_v17   ;;  %1944 = vmatprep.subr.msk.mxu0 %vm520_vm0, %v475_v20  ;;  %v451_v55 = vld [vmem:[%s2210_s28 + $0x18] sm:$0xff]  ;;  %v466_v56 = vld [vmem:[%s2210_s28 + $0x90] sm:$0xff]  ;;  %v1286_v57 = vld [vmem:[%s2276_s19 + $0xc8] sm:$0xff] }
  0x1e   : > { %866 = vperm.xlu1 %2045, %v437_v18   ;;  %v1270_v58 = vld [vmem:[%s2276_s19 + $0x48] sm:$0xff]  ;;  %v450_v59 = vld [vmem:[%s2210_s28 + $0x10] sm:$0xff]  ;;  %v1285_v61 = vld [vmem:[%s2276_s19 + $0xc0] sm:$0xff] }
  0x1f   : > { %v465_v60 = vld [vmem:[%s2210_s28 + $0x88] sm:$0xff]  ;;  %v1269_v62 = vld [vmem:[%s2276_s19 + $0x40] sm:$0xff]  ;;  %v1284_v2 = vld [vmem:[%s2276_s19 + $0xb8] sm:$0xff] }
  0x20   : > { %1945 = vmatpush3.xpose.msk.msra.mxu0 %vm520_vm0, %v459_v23  ;;  %v449_v63 = vld [vmem:[%s2210_s28 + $0x8] sm:$0xff]  ;;  %v464_v1 = vld [vmem:[%s2210_s28 + $0x80] sm:$0xff]  ;;  %v1268_v3 = vld [vmem:[%s2276_s19 + $0x38] sm:$0xff] }
  0x21   : > { %861 = vperm.xlu0 %2044, %v436_v21   ;;  %1946 = vmatprep.subr.msk.mxu0 %vm520_vm0, %v474_v24  ;;  %v448_v4 = vld [vmem:[%s2210_s28] sm:$0xff]  ;;  %v1283_v5 = vld [vmem:[%s2276_s19 + $0xb0] sm:$0xff]  ;;  %v408_v7 = vld [vmem:[%s2702_s3 + $0x8] sm:$0xff] }
  0x22   : > { %856 = vperm.xlu1 %2045, %v435_v22   ;;  %v1267_v6 = vld [vmem:[%s2276_s19 + $0x30] sm:$0xff]  ;;  %v1282_v8 = vld [vmem:[%s2276_s19 + $0xa8] sm:$0xff]  ;;  %v1281_v11 = vld [vmem:[%s2276_s19 + $0xa0] sm:$0xff] }
  0x23   : > { %v1266_v9 = vld [vmem:[%s2276_s19 + $0x28] sm:$0xff]  ;;  %v409_v10 = vld [vmem:[%s2702_s3 + $0x10] sm:$0xff]  ;;  %v1265_v12 = vld [vmem:[%s2276_s19 + $0x20] sm:$0xff] }
  0x24   : > { %1947 = vmatpush3.xpose.msk.msra.mxu0 %vm520_vm0, %v458_v27  ;;  %v1280_v13 = vld [vmem:[%s2276_s19 + $0x98] sm:$0xff]  ;;  %v411_v15 = vld [vmem:[%s2702_s3 + $0x20] sm:$0xff]  ;;  %v1279_v16 = vld [vmem:[%s2276_s19 + $0x90] sm:$0xff] }
  0x25   : > { %851 = vperm.xlu0 %2044, %v434_v25   ;;  %1948 = vmatprep.subr.msk.mxu0 %vm520_vm0, %v473_v28  ;;  %v1264_v14 = vld [vmem:[%s2276_s19 + $0x18] sm:$0xff]  ;;  %v1263_v17 = vld [vmem:[%s2276_s19 + $0x10] sm:$0xff]  ;;  %v412_v18 = vld [vmem:[%s2702_s3 + $0x28] sm:$0xff]  ;;  %v2119_v25 = vmov 0.0  }
  0x26   : > { %846 = vperm.xlu1 %2045, %v433_v26   ;;  %v1278_v19 = vld [vmem:[%s2276_s19 + $0x88] sm:$0xff]  ;;  %v413_v21 = vld [vmem:[%s2702_s3 + $0x30] sm:$0xff]  ;;  %v1277_v22 = vld [vmem:[%s2276_s19 + $0x80] sm:$0xff]  ;;  %975 = vmatprep.mubr.f32.mxu1 %v2119_v25 }
  0x27   : > { %v1262_v20 = vld [vmem:[%s2276_s19 + $0x8] sm:$0xff]  ;;  %v1261_v23 = vld [vmem:[%s2276_s19] sm:$0xff]  ;;  %v414_v24 = vld [vmem:[%s2702_s3 + $0x38] sm:$0xff] }
  0x28   : > { %1949 = vmatpush3.xpose.msk.msra.mxu0 %vm520_vm0, %v457_v31 }
  0x29   : > { %841 = vperm.xlu0 %2044, %v432_v29   ;;  %1950 = vmatprep.subr.msk.mxu0 %vm520_vm0, %v472_v32 }
  0x2a   : > { %836 = vperm.xlu1 %2045, %v431_v30  }
  0x2c   : > { %1951 = vmatpush3.xpose.msk.msra.mxu0 %vm520_vm0, %v456_v35 }
  0x2d   : > { %1450 = vperm.xlu0 %2044, %v1292_v33   ;;  %1952 = vmatprep.subr.msk.mxu0 %vm520_vm0, %v471_v36 }
  0x2e   : > { %1370 = vperm.xlu1 %2045, %v1276_v34  }
  0x30   : > { %1953 = vmatpush3.xpose.msk.msra.mxu0 %vm520_vm0, %v455_v39 }
  0x31   : > { %1445 = vperm.xlu0 %2044, %v1291_v37   ;;  %1954 = vmatprep.subr.msk.mxu0 %vm520_vm0, %v470_v40 }
  0x32   : > { %1365 = vperm.xlu1 %2045, %v1275_v38  }
  0x34   : > { %1955 = vmatpush3.xpose.msk.msra.mxu0 %vm520_vm0, %v454_v43 }
  0x35   : > { %1440 = vperm.xlu0 %2044, %v1290_v41   ;;  %1956 = vmatprep.subr.msk.mxu0 %vm520_vm0, %v469_v44 }
  0x36   : > { %1360 = vperm.xlu1 %2045, %v1274_v42  }
  0x38   : > { %1957 = vmatpush3.xpose.msk.msra.mxu0 %vm520_vm0, %v453_v47 }
  0x39   : > { %1435 = vperm.xlu0 %2044, %v1289_v45   ;;  %1958 = vmatprep.subr.msk.mxu0 %vm520_vm0, %v468_v48 }
  0x3a   : > { %1355 = vperm.xlu1 %2045, %v1273_v46  }
  0x3c   : > { %1959 = vmatpush3.xpose.msk.msra.mxu0 %vm520_vm0, %v452_v51 }
  0x3d   : > { %1430 = vperm.xlu0 %2044, %v1288_v49   ;;  %1960 = vmatprep.subr.msk.mxu0 %vm520_vm0, %v467_v52 }
  0x3e   : > { %1350 = vperm.xlu1 %2045, %v1272_v50  }
  0x40   : > { %1961 = vmatpush3.xpose.msk.msra.mxu0 %vm520_vm0, %v451_v55 }
  0x41   : > { %1425 = vperm.xlu0 %2044, %v1287_v53   ;;  %1962 = vmatprep.subr.msk.mxu0 %vm520_vm0, %v466_v56 }
  0x42   : > { %1345 = vperm.xlu1 %2045, %v1271_v54  }
  0x44   : > { %1963 = vmatpush3.xpose.msk.msra.mxu0 %vm520_vm0, %v450_v59 }
  0x45   : > { %1420 = vperm.xlu0 %2044, %v1286_v57   ;;  %1964 = vmatprep.subr.msk.mxu0 %vm520_vm0, %v465_v60 }
  0x46   : > { %1340 = vperm.xlu1 %2045, %v1270_v58  }
  0x48   : > { %1965 = vmatpush3.xpose.msk.msra.mxu0 %vm520_vm0, %v449_v63 }
  0x49   : > { %1415 = vperm.xlu0 %2044, %v1285_v61   ;;  %1966 = vmatprep.subr.msk.mxu0 %vm520_vm0, %v464_v1 }
  0x4a   : > { %1335 = vperm.xlu1 %2045, %v1269_v62  }
  0x4c   : > { %1967 = vmatpush3.xpose.msk.msra.mxu0 %vm520_vm0, %v448_v4 }
  0x4d   : > { %1410 = vperm.xlu0 %2044, %v1284_v2  }
  0x4e   : > { %1330 = vperm.xlu1 %2045, %v1268_v3  }
  0x4f   : > { %1969 = vmatmul.mubr.msk.f32.vlgmr.msra.gmra.mxu0 %vm520_vm0, %v2188_v0  ;;  %v410_v0 = vld [vmem:[%s2702_s3 + $0x18] sm:$0xff] }
  0x50   : > { %1970 = vmatprep.mubr.msk.f32.mxu0 %vm520_vm0, %v408_v7 }
  0x51   : > { %1405 = vperm.xlu0 %2044, %v1283_v5  }
  0x52   : > { %1325 = vperm.xlu1 %2045, %v1267_v6  }
  0x53   : > { %1971 = vmatmul.mubr.msk.f32.gmra.mxu0 %vm520_vm0, %v408_v7 }
  0x54   : > { %1972 = vmatprep.mubr.msk.f32.mxu0 %vm520_vm0, %v409_v10 }
  0x55   : > { %1400 = vperm.xlu0 %2044, %v1282_v8  }
  0x56   : > { %1320 = vperm.xlu1 %2045, %v1266_v9  }
  0x57   : > { %1973 = vmatmul.mubr.msk.f32.gmra.mxu0 %vm520_vm0, %v409_v10 }
  0x58   : > { %1974 = vmatprep.mubr.msk.f32.mxu0 %vm520_vm0, %v410_v0 }
  0x59   : > { %1395 = vperm.xlu0 %2044, %v1281_v11  }
  0x5a   : > { %1315 = vperm.xlu1 %2045, %v1265_v12  }
  0x5b   : > { %1975 = vmatmul.mubr.msk.f32.gmra.mxu0 %vm520_vm0, %v410_v0 }
  0x5c   : > { %1976 = vmatprep.mubr.msk.f32.mxu0 %vm520_vm0, %v411_v15 }
  0x5d   : > { %1390 = vperm.xlu0 %2044, %v1280_v13  }
  0x5e   : > { %1310 = vperm.xlu1 %2045, %v1264_v14  }
  0x5f   : > { %1977 = vmatmul.mubr.msk.f32.gmra.mxu0 %vm520_vm0, %v411_v15 }
  0x60   : > { %1978 = vmatprep.mubr.msk.f32.mxu0 %vm520_vm0, %v412_v18 }
  0x61   : > { %1385 = vperm.xlu0 %2044, %v1279_v16  }
  0x62   : > { %1305 = vperm.xlu1 %2045, %v1263_v17  }
  0x63   : > { %1979 = vmatmul.mubr.msk.f32.gmra.mxu0 %vm520_vm0, %v412_v18 }
  0x64   : > { %1980 = vmatprep.mubr.msk.f32.mxu0 %vm520_vm0, %v413_v21 }
  0x65   : > { %1380 = vperm.xlu0 %2044, %v1278_v19  }
  0x66   : > { %1300 = vperm.xlu1 %2045, %v1262_v20  }
  0x67   : > { %1981 = vmatmul.mubr.msk.f32.gmra.mxu0 %vm520_vm0, %v413_v21 }
  0x68   : > { %1982 = vmatprep.mubr.msk.f32.mxu0 %vm520_vm0, %v414_v24 }
  0x69   : > { %1375 = vperm.xlu0 %2044, %v1277_v22  }
  0x6a   : > { %1295 = vperm.xlu1 %2045, %v1261_v23  }
  0x6b   : > { %1983 = vmatmul.mubr.msk.f32.gmra.mxu0 %vm520_vm0, %v414_v24 }
  0x6c   : > { %963 = vmatprep.mubr.f32.mxu0 %v2119_v25 }
  0x88   : > { %v518_v35 = vpop.permute.xlu0 %517 }
  0x89   : > { %v508_v37 = vpop.permute.xlu1 %507 }
  0x8c   : > { %v513_v40 = vpop.permute.xlu0 %512 }
  0x8d   : > { %v503_v43 = vpop.permute.xlu1 %502 }
  0x90   : > { %v498_v49 = vpop.permute.xlu0 %497 }
  0x91   : > { %v493_v55 = vpop.permute.xlu1 %492 }
  0x94   : > { %v488_v3 = vpop.permute.xlu0 %487 }
  0x95   : > { %v483_v8 = vpop.permute.xlu1 %482 }
 0x10f   : > { %v707_v26 = vpop.f32.mrf.mxu0 }
 0x110   : > { %v2424_v0 = vadd.f32 %v707_v26, %v483_v8 }
 0x111   : > { %v709_v27 = vpop.f32.mrf.mxu0 }
 0x112   : > { %v2421_v11 = vadd.f32 %v709_v27, %v483_v8  ;;  %v770_v17 = vmul.f32 0.70710677, %v2424_v0 }
 0x113   : > { %v713_v28 = vpop.f32.mrf.mxu0 }
 0x114   : > { %v2418_v9 = vadd.f32 %v713_v28, %v488_v3  ;;  %v771_v16 = vmul.f32 0.70710677, %v2421_v11 }
 0x115   : > { %v715_v29 = vpop.f32.mrf.mxu0 }
 0x116   : > { %v2415_v6 = vadd.f32 %v715_v29, %v488_v3  ;;  %v772_v15 = vmul.f32 0.70710677, %v2418_v9 }
 0x117   : > { %v719_v30 = vpop.f32.mrf.mxu0 }
 0x118   : > { %v2412_v4 = vadd.f32 %v719_v30, %v493_v55  ;;  %v773_v14 = vmul.f32 0.70710677, %v2415_v6 }
 0x119   : > { %v721_v31 = vpop.f32.mrf.mxu0 }
 0x11a   : > { %v2409_v63 = vadd.f32 %v721_v31, %v493_v55  ;;  %v774_v13 = vmul.f32 0.70710677, %v2412_v4 }
 0x11b   : > { %v725_v32 = vpop.f32.mrf.mxu0 }
 0x11c   : > { %v2406_v61 = vadd.f32 %v725_v32, %v498_v49  ;;  %v775_v12 = vmul.f32 0.70710677, %v2409_v63 }
 0x11d   : > { %v727_v33 = vpop.f32.mrf.mxu0 }
 0x11e   : > { %v2404_v59 = vadd.f32 %v727_v33, %v498_v49  ;;  %v776_v10 = vmul.f32 0.70710677, %v2406_v61  ;;  %v760_v3 = vmul.f32 0.5, %v2406_v61 }
 0x11f   : > { %v731_v34 = vpop.f32.mrf.mxu0 }
 0x120   : > { %v2401_v56 = vadd.f32 %v731_v34, %v503_v43  ;;  %v777_v7 = vmul.f32 0.70710677, %v2404_v59 }
 0x121   : > { %v733_v36 = vpop.f32.mrf.mxu0 }
 0x122   : > { %v2398_v52 = vadd.f32 %v733_v36, %v503_v43  ;;  %v778_v5 = vmul.f32 0.70710677, %v2401_v56 }
 0x123   : > { %v737_v38 = vpop.f32.mrf.mxu0 }
 0x124   : > { %v2396_v50 = vadd.f32 %v737_v38, %v508_v37  ;;  %v779_v1 = vmul.f32 0.70710677, %v2398_v52 }
 0x125   : > { %v739_v39 = vpop.f32.mrf.mxu0 }
 0x126   : > { %v2389_v41 = vadd.f32 %v739_v39, %v508_v37  ;;  %v780_v62 = vmul.f32 0.70710677, %v2396_v50  ;;  %v764_v49 = vmul.f32 0.5, %v2396_v50  ;;  %v761_v50 = vmul.f32 0.5, %v2404_v59 }
 0x127   : > { %v743_v42 = vpop.f32.mrf.mxu0  ;;  %v758_v59 = vmul.f32 0.5, %v2412_v4 }
 0x128   : > { %v2391_v45 = vadd.f32 %v743_v42, %v513_v40  ;;  %v781_v47 = vmul.f32 0.70710677, %v2389_v41  ;;  %v765_v42 = vmul.f32 0.5, %v2389_v41 }
 0x129   : > { %v745_v44 = vpop.f32.mrf.mxu0 }
 0x12a   : > { %v2393_v46 = vadd.f32 %v745_v44, %v513_v40  ;;  %v782_v57 = vmul.f32 0.70710677, %v2391_v45  ;;  %2046 = verf.f32 %v781_v47  ;;  %v766_v38 = vmul.f32 0.5, %v2391_v45 }
 0x12b   : > { %v749_v48 = vpop.f32.mrf.mxu0 }
 0x12c   : > { %v750_v51 = vadd.f32 %v749_v48, %v518_v35  ;;  %v783_v53 = vmul.f32 0.70710677, %v2393_v46  ;;  %v767_v33 = vmul.f32 0.5, %v2393_v46 }
 0x12d   : > { %v751_v54 = vpop.f32.mrf.mxu0 }
 0x12e   : > { %v784_v58 = vmul.f32 0.70710677, %v750_v51  ;;  %v752_v60 = vadd.f32 %v751_v54, %v518_v35  ;;  %v768_v31 = vmul.f32 0.5, %v750_v51 }
 0x130   : > { %2048 = verf.f32 %v784_v58  ;;  %v785_v2 = vmul.f32 0.70710677, %v752_v60  ;;  %v769_v26 = vmul.f32 0.5, %v752_v60 }
 0x131   : > { %2050 = verf.f32 %v783_v53  ;;  %v763_v53 = vmul.f32 0.5, %v2398_v52 }
 0x132   : > { %2052 = verf.f32 %v782_v57  ;;  %v762_v57 = vmul.f32 0.5, %v2401_v56  ;;  %v759_v56 = vmul.f32 0.5, %v2409_v63 }
 0x133   : > { %2054 = verf.f32 %v785_v2 }
 0x134   : > { %2056 = verf.f32 %v780_v62 }
 0x135   : > { %2058 = verf.f32 %v779_v1 }
 0x136   : > { %2060 = verf.f32 %v778_v5 }
 0x137   : > { %2062 = verf.f32 %v777_v7  ;;  %v2047_v18 = vpop.eup %2046 }
 0x138   : > { %2064 = verf.f32 %v776_v10  ;;  %v813_v35 = vadd.f32 1.0, %v2047_v18  ;;  %v755_v18 = vmul.f32 0.5, %v2421_v11  ;;  %v425_v11 = vld [vmem:[%s2704_s5 + $0x10] sm:$0xff] }
 0x139   : > { %2066 = verf.f32 %v775_v12 }
 0x13a   : > { %2068 = verf.f32 %v774_v13  ;;  %v829_v45 = vmul.f32 %v813_v35, %v765_v42 }
 0x13b   : > { %2070 = verf.f32 %v773_v14  ;;  %v757_v14 = vmul.f32 0.5, %v2415_v6 }
 0x13c   : > { %2072 = verf.f32 %v772_v15 }
 0x13d   : > { %v2049_v19 = vpop.eup %2048  ;;  %2074 = verf.f32 %v771_v16 }
 0x13e   : > { %v2051_v20 = vpop.eup %2050  ;;  %2076 = verf.f32 %v770_v17  ;;  %v816_v23 = vadd.f32 1.0, %v2049_v19  ;;  %v756_v17 = vmul.f32 0.5, %v2418_v9  ;;  %v754_v19 = vmul.f32 0.5, %v2424_v0  ;;  %v423_v9 = vld [vmem:[%s2704_s5] sm:$0xff]  ;;  %v424_v0 = vld [vmem:[%s2704_s5 + $0x8] sm:$0xff] }
 0x13f   : > { %v2053_v21 = vpop.eup %2052  ;;  %v815_v28 = vadd.f32 1.0, %v2051_v20 }
 0x140   : > { %v2055_v22 = vpop.eup %2054  ;;  %v814_v30 = vadd.f32 1.0, %v2053_v21  ;;  %v832_v39 = vmul.f32 %v816_v23, %v768_v31  ;;  %v427_v23 = vld [vmem:[%s2704_s5 + $0x20] sm:$0xff]  ;;  %v867_v31 = vpop.permute.xlu1 %866 }
 0x141   : > { %v2057_v24 = vpop.eup %2056  ;;  %v817_v27 = vadd.f32 1.0, %v2055_v22  ;;  %v831_v43 = vmul.f32 %v815_v28, %v767_v33  ;;  %v426_v22 = vld [vmem:[%s2704_s5 + $0x18] sm:$0xff]  ;;  %v872_v28 = vpop.permute.xlu0 %871 }
 0x142   : > { %v2059_v29 = vpop.eup %2058  ;;  %v812_v37 = vadd.f32 1.0, %v2057_v24  ;;  %v830_v51 = vmul.f32 %v814_v30, %v766_v38  ;;  %v428_v24 = vld [vmem:[%s2704_s5 + $0x28] sm:$0xff] }
 0x143   : > { %v2061_v32 = vpop.eup %2060  ;;  %v833_v34 = vmul.f32 %v817_v27, %v769_v26  ;;  %v811_v44 = vadd.f32 1.0, %v2059_v29  ;;  %v429_v26 = vld [vmem:[%s2704_s5 + $0x30] sm:$0xff]  ;;  %v430_v27 = vld [vmem:[%s2704_s5 + $0x38] sm:$0xff] }
 0x144   : > { %v2063_v36 = vpop.eup %2062  ;;  %v810_v48 = vadd.f32 1.0, %v2061_v32  ;;  %v828_v58 = vmul.f32 %v812_v37, %v764_v49 }
 0x145   : > { %v2065_v40 = vpop.eup %2064  ;;  %915 = vmatprep.subr.mxu0 %v833_v34  ;;  %2018 = vmatprep.subr.mxu1 %v833_v34  ;;  %v809_v54 = vadd.f32 1.0, %v2063_v36  ;;  %v827_v62 = vmul.f32 %v811_v44, %v763_v53  ;;  %v862_v33 = vpop.permute.xlu0 %861 }
 0x146   : > { %v2067_v47 = vpop.eup %2066  ;;  %916 = vmatpush1.msra.mxu0 %v832_v39  ;;  %2026 = vmatpush1.msra.mxu1 %v832_v39  ;;  %v808_v41 = vadd.f32 1.0, %v2065_v40  ;;  %v826_v5 = vmul.f32 %v810_v48, %v762_v57  ;;  %v857_v36 = vpop.permute.xlu1 %856 }
 0x147   : > { %v2069_v46 = vpop.eup %2068  ;;  %917 = vmatprep.subr.mxu0 %v831_v43  ;;  %2019 = vmatprep.subr.mxu1 %v831_v43  ;;  %v807_v1 = vadd.f32 1.0, %v2067_v47  ;;  %v825_v8 = vmul.f32 %v809_v54, %v761_v50 }
 0x148   : > { %v2071_v55 = vpop.eup %2070  ;;  %918 = vmatpush1.msra.mxu0 %v830_v51  ;;  %2027 = vmatpush1.msra.mxu1 %v830_v51  ;;  %v806_v52 = vadd.f32 1.0, %v2069_v46  ;;  %v824_v13 = vmul.f32 %v808_v41, %v760_v3 }
 0x149   : > { %v2073_v60 = vpop.eup %2072  ;;  %919 = vmatprep.subr.mxu0 %v829_v45  ;;  %2020 = vmatprep.subr.mxu1 %v829_v45  ;;  %v805_v10 = vadd.f32 1.0, %v2071_v55  ;;  %v823_v61 = vmul.f32 %v807_v1, %v759_v56  ;;  %v852_v38 = vpop.permute.xlu0 %851 }
 0x14a   : > { %v2075_v2 = vpop.eup %2074  ;;  %920 = vmatpush1.msra.mxu0 %v828_v58  ;;  %2028 = vmatpush1.msra.mxu1 %v828_v58  ;;  %v804_v12 = vadd.f32 1.0, %v2073_v60  ;;  %v822_v63 = vmul.f32 %v806_v52, %v758_v59  ;;  %v847_v43 = vpop.permute.xlu1 %846 }
 0x14b   : > { %v2077_v7 = vpop.eup %2076  ;;  %921 = vmatprep.subr.mxu0 %v827_v62  ;;  %2021 = vmatprep.subr.mxu1 %v827_v62  ;;  %v803_v15 = vadd.f32 1.0, %v2075_v2  ;;  %v821_v4 = vmul.f32 %v805_v10, %v757_v14 }
 0x14c   : > { %922 = vmatpush1.msra.mxu0 %v826_v5  ;;  %2029 = vmatpush1.msra.mxu1 %v826_v5  ;;  %v802_v16 = vadd.f32 1.0, %v2077_v7  ;;  %v820_v20 = vmul.f32 %v804_v12, %v756_v17 }
 0x14d   : > { %923 = vmatprep.subr.mxu0 %v825_v8  ;;  %2022 = vmatprep.subr.mxu1 %v825_v8  ;;  %v819_v6 = vmul.f32 %v803_v15, %v755_v18  ;;  %v842_v49 = vpop.permute.xlu0 %841 }
 0x14e   : > { %924 = vmatpush1.msra.mxu0 %v824_v13  ;;  %2030 = vmatpush1.msra.mxu1 %v824_v13  ;;  %v818_v21 = vmul.f32 %v802_v16, %v754_v19  ;;  %v837_v57 = vpop.permute.xlu1 %836 }
 0x14f   : > { %925 = vmatprep.subr.mxu0 %v823_v61  ;;  %2023 = vmatprep.subr.mxu1 %v823_v61 }
 0x150   : > { %926 = vmatpush1.msra.mxu0 %v822_v63  ;;  %2031 = vmatpush1.msra.mxu1 %v822_v63 }
 0x151   : > { %927 = vmatprep.subr.mxu0 %v821_v4  ;;  %2024 = vmatprep.subr.mxu1 %v821_v4  ;;  %v2501_v7 = vpop.permute.xlu0 %1450 }
 0x152   : > { %928 = vmatpush1.msra.mxu0 %v820_v20  ;;  %2032 = vmatpush1.msra.mxu1 %v820_v20  ;;  %v2512_v15 = vpop.permute.xlu1 %1370 }
 0x153   : > { %929 = vmatprep.subr.mxu0 %v819_v6  ;;  %2025 = vmatprep.subr.mxu1 %v819_v6 }
 0x154   : > { %930 = vmatpush1.msra.mxu0 %v818_v21  ;;  %2033 = vmatpush1.msra.mxu1 %v818_v21 }
 0x155   : > { %1885 = vmatmul.mubr.msk.f32.vlgmr.msra.gmra.mxu0 %vm874_vm1, %v423_v9  ;;  %1887 = vmatmul.mubr.msk.f32.vlgmr.msra.gmra.mxu1 %vm874_vm1, %v425_v11  ;;  %v2523_v20 = vpop.permute.xlu0 %1445 }
 0x156   : > { %969 = vmatprep.mubr.f32.mxu0 %v2119_v25  ;;  %981 = vmatprep.mubr.f32.mxu1 %v2119_v25 }
 0x159   : > { %1886 = vmatmul.mubr.msk.f32.gmra.mxu0 %vm874_vm1, %v424_v0  ;;  %1888 = vmatmul.mubr.msk.f32.gmra.mxu1 %vm874_vm1, %v426_v22  ;;  %v2530_v0 = vpop.permute.xlu1 %1365 }
 0x15a   : > { %987 = vmatprep.mubr.f32.mxu1 %v2119_v25 }
 0x15d   : > { %1889 = vmatmul.mubr.msk.f32.gmra.mxu1 %vm874_vm1, %v427_v23 }
 0x15e   : > { %993 = vmatprep.mubr.f32.mxu1 %v2119_v25 }
 0x161   : > { %1890 = vmatmul.mubr.msk.f32.gmra.mxu1 %vm874_vm1, %v428_v24 }
 0x162   : > { %999 = vmatprep.mubr.f32.mxu1 %v2119_v25 }
 0x165   : > { %1891 = vmatmul.mubr.msk.f32.gmra.mxu1 %vm874_vm1, %v429_v26  ;;  %v2534_v26 = vpop.permute.xlu0 %1440 }
 0x166   : > { %1005 = vmatprep.mubr.f32.mxu1 %v2119_v25 }
 0x169   : > { %1892 = vmatmul.mubr.msk.f32.gmra.mxu1 %vm874_vm1, %v430_v27 }
 0x16a   : > { %1180 = vmatprep.mubr.f32.mxu1 %v2119_v25 }
 0x215   : > { %v977_v29 = vpop.f32.mrf.mxu1  ;;  %v965_v39 = vpop.f32.mrf.mxu0 }
 0x216   : > { %v2509_v14 = vadd.f32 %v977_v29, %v847_v43  ;;  %v2525_v6 = vadd.f32 %v965_v39, %v837_v57 }
 0x217   : > { %v979_v30 = vpop.f32.mrf.mxu1  ;;  %v967_v47 = vpop.f32.mrf.mxu0 }
 0x218   : > { %v2506_v12 = vadd.f32 %v979_v30, %v847_v43  ;;  %v2520_v4 = vadd.f32 %v967_v47, %v837_v57  ;;  %v1032_v21 = vmul.f32 0.70710677, %v2509_v14  ;;  %v1028_v23 = vmul.f32 0.70710677, %v2525_v6  ;;  %v2536_v30 = vpop.permute.xlu1 %1360 }
 0x219   : > { %v983_v32 = vpop.f32.mrf.mxu1  ;;  %v971_v45 = vpop.f32.mrf.mxu0 }
 0x21a   : > { %v2503_v56 = vadd.f32 %v983_v32, %v852_v38  ;;  %v2517_v63 = vadd.f32 %v971_v45, %v842_v49  ;;  %v1033_v19 = vmul.f32 0.70710677, %v2506_v12  ;;  %v1029_v22 = vmul.f32 0.70710677, %v2520_v4 }
 0x21b   : > { %v985_v34 = vpop.f32.mrf.mxu1  ;;  %v973_v8 = vpop.f32.mrf.mxu0 }
 0x21c   : > { %v2499_v52 = vadd.f32 %v985_v34, %v852_v38  ;;  %v2514_v16 = vadd.f32 %v973_v8, %v842_v49  ;;  %v1034_v18 = vmul.f32 0.70710677, %v2503_v56  ;;  %v1030_v11 = vmul.f32 0.70710677, %v2517_v63  ;;  %v2538_v38 = vpop.permute.xlu0 %1435  ;;  %v2542_v57 = vpop.permute.xlu1 %1355 }
 0x21d   : > { %v989_v35 = vpop.f32.mrf.mxu1 }
 0x21e   : > { %v2495_v50 = vadd.f32 %v989_v35, %v857_v36  ;;  %v1035_v17 = vmul.f32 0.70710677, %v2499_v52  ;;  %v1031_v9 = vmul.f32 0.70710677, %v2514_v16 }
 0x21f   : > { %v991_v37 = vpop.f32.mrf.mxu1 }
 0x220   : > { %v2493_v58 = vadd.f32 %v991_v37, %v857_v36  ;;  %v1036_v61 = vmul.f32 0.70710677, %v2495_v50 }
 0x221   : > { %v995_v40 = vpop.f32.mrf.mxu1 }
 0x222   : > { %v2489_v54 = vadd.f32 %v995_v40, %v862_v33  ;;  %v1037_v59 = vmul.f32 0.70710677, %v2493_v58 }
 0x223   : > { %v997_v42 = vpop.f32.mrf.mxu1 }
 0x224   : > { %v2484_v44 = vadd.f32 %v997_v42, %v862_v33  ;;  %v1038_v10 = vmul.f32 0.70710677, %v2489_v54 }
 0x225   : > { %v1001_v48 = vpop.f32.mrf.mxu1 }
 0x226   : > { %v2486_v51 = vadd.f32 %v1001_v48, %v867_v31  ;;  %v1039_v53 = vmul.f32 0.70710677, %v2484_v44 }
 0x227   : > { %v1003_v46 = vpop.f32.mrf.mxu1 }
 0x228   : > { %v2491_v55 = vadd.f32 %v1003_v46, %v867_v31  ;;  %v1040_v62 = vmul.f32 0.70710677, %v2486_v51  ;;  %2078 = verf.f32 %v1039_v53  ;;  %v1024_v53 = vmul.f32 0.5, %v2486_v51 }
 0x229   : > { %v1007_v41 = vpop.f32.mrf.mxu1 }
 0x22a   : > { %v1008_v60 = vadd.f32 %v1007_v41, %v872_v28  ;;  %v1041_v1 = vmul.f32 0.70710677, %v2491_v55  ;;  %v1025_v43 = vmul.f32 0.5, %v2491_v55 }
 0x22b   : > { %v1009_v2 = vpop.f32.mrf.mxu1 }
 0x22c   : > { %v1042_v3 = vmul.f32 0.70710677, %v1008_v60  ;;  %v1010_v5 = vadd.f32 %v1009_v2, %v872_v28  ;;  %2080 = verf.f32 %v1041_v1  ;;  %v1026_v40 = vmul.f32 0.5, %v1008_v60 }
 0x22e   : > { %2082 = verf.f32 %v1042_v3  ;;  %v1043_v13 = vmul.f32 0.70710677, %v1010_v5  ;;  %v1027_v34 = vmul.f32 0.5, %v1010_v5  ;;  %v1022_v5 = vmul.f32 0.5, %v2489_v54 }
 0x22f   : > { %2084 = verf.f32 %v1040_v62  ;;  %v1023_v62 = vmul.f32 0.5, %v2484_v44  ;;  %v1020_v44 = vmul.f32 0.5, %v2495_v50  ;;  %v1017_v50 = vmul.f32 0.5, %v2506_v12 }
 0x230   : > { %2086 = verf.f32 %v1043_v13 }
 0x231   : > { %2088 = verf.f32 %v1038_v10  ;;  %v1021_v10 = vmul.f32 0.5, %v2493_v58 }
 0x232   : > { %2090 = verf.f32 %v1037_v59 }
 0x233   : > { %2092 = verf.f32 %v1036_v61  ;;  %v2547_v61 = vpop.permute.xlu0 %1430 }
 0x234   : > { %2094 = verf.f32 %v1035_v17 }
 0x235   : > { %2096 = verf.f32 %v1034_v18  ;;  %v2079_v24 = vpop.eup %2078 }
 0x236   : > { %2098 = verf.f32 %v1033_v19  ;;  %v1071_v48 = vadd.f32 1.0, %v2079_v24 }
 0x237   : > { %2100 = verf.f32 %v1032_v21  ;;  %v1019_v21 = vmul.f32 0.5, %v2499_v52  ;;  %v1016_v52 = vmul.f32 0.5, %v2509_v14 }
 0x238   : > { %2102 = verf.f32 %v1031_v9  ;;  %v1087_v51 = vmul.f32 %v1071_v48, %v1023_v62  ;;  %v1258_v62 = vld [vmem:[%s2560_s16 + $0xe8] sm:$0xff] }
 0x239   : > { %2104 = verf.f32 %v1030_v11  ;;  %v2081_v27 = vpop.eup %2080 }
 0x23a   : > { %2106 = verf.f32 %v1029_v22  ;;  %v1073_v36 = vadd.f32 1.0, %v2081_v27  ;;  %v1018_v22 = vmul.f32 0.5, %v2503_v56  ;;  %v2552_v27 = vpop.permute.xlu1 %1350  ;;  %v1015_v56 = vmul.f32 0.5, %v2514_v16 }
 0x23b   : > { %v2083_v28 = vpop.eup %2082  ;;  %2108 = verf.f32 %v1028_v23 }
 0x23c   : > { %v2085_v29 = vpop.eup %2084  ;;  %v1074_v32 = vadd.f32 1.0, %v2083_v28  ;;  %v1089_v1 = vmul.f32 %v1073_v36, %v1025_v43  ;;  %v1014_v36 = vmul.f32 0.5, %v2517_v63  ;;  %v1244_v43 = vld [vmem:[%s2560_s16 + $0x78] sm:$0xff]  ;;  %v439_v63 = vld [vmem:[%s2706_s7] sm:$0xff] }
 0x23d   : > { %v2087_v31 = vpop.eup %2086  ;;  %v1072_v39 = vadd.f32 1.0, %v2085_v29 }
 0x23e   : > { %v2089_v33 = vpop.eup %2088  ;;  %v1075_v35 = vadd.f32 1.0, %v2087_v31  ;;  %v1090_v45 = vmul.f32 %v1074_v32, %v1026_v40  ;;  %v1260_v40 = vld [vmem:[%s2560_s16 + $0xf8] sm:$0xff] }
 0x23f   : > { %v2091_v37 = vpop.eup %2090  ;;  %v1070_v46 = vadd.f32 1.0, %v2089_v33  ;;  %v1088_v55 = vmul.f32 %v1072_v39, %v1024_v53 }
 0x240   : > { %v2093_v42 = vpop.eup %2092  ;;  %v1091_v47 = vmul.f32 %v1075_v35, %v1027_v34  ;;  %v1069_v2 = vadd.f32 1.0, %v2091_v37  ;;  %v2563_v34 = vpop.permute.xlu0 %1425  ;;  %v1013_v37 = vmul.f32 0.5, %v2520_v4  ;;  %v1484_v4 = vmul.f32 %v2501_v7, %v1260_v40  ;;  %v440_v7 = vld [vmem:[%s2706_s7 + $0x8] sm:$0xff] }
 0x241   : > { %v2095_v49 = vpop.eup %2094  ;;  %v1068_v60 = vadd.f32 1.0, %v2093_v42  ;;  %v1086_v18 = vmul.f32 %v1070_v46, %v1022_v5  ;;  %v1012_v42 = vmul.f32 0.5, %v2525_v6  ;;  %v1468_v6 = vmul.f32 %v2512_v15, %v1244_v43  ;;  %v441_v5 = vld [vmem:[%s2706_s7 + $0x10] sm:$0xff] }
 0x242   : > { %v2097_v41 = vpop.eup %2096  ;;  %1132 = vmatprep.subr.mxu1 %v1091_v47  ;;  %v1067_v59 = vadd.f32 1.0, %v2095_v49  ;;  %v1085_v54 = vmul.f32 %v1069_v2, %v1021_v10  ;;  %v2570_v47 = vpop.permute.xlu1 %1345  ;;  %v1259_v49 = vld [vmem:[%s2560_s16 + $0xf0] sm:$0xff]  ;;  %v1242_v2 = vld [vmem:[%s2560_s16 + $0x68] sm:$0xff]  ;;  %v1256_v10 = vld [vmem:[%s2560_s16 + $0xd8] sm:$0xff] }
 0x243   : > { %v2099_v3 = vpop.eup %2098  ;;  %1133 = vmatpush1.msra.mxu1 %v1090_v45  ;;  %v1066_v17 = vadd.f32 1.0, %v2097_v41  ;;  %v1084_v23 = vmul.f32 %v1068_v60, %v1020_v44  ;;  %v1483_v45 = vmul.f32 %v2523_v20, %v1259_v49  ;;  %v1243_v41 = vld [vmem:[%s2560_s16 + $0x70] sm:$0xff]  ;;  %v443_v44 = vld [vmem:[%s2706_s7 + $0x20] sm:$0xff] }
 0x244   : > { %v2101_v8 = vpop.eup %2100  ;;  %1134 = vmatprep.subr.mxu1 %v1089_v1  ;;  %v1065_v9 = vadd.f32 1.0, %v2099_v3  ;;  %v1083_v28 = vmul.f32 %v1067_v59, %v1019_v21  ;;  %v1421_v53 = vpop.permute.xlu0 %1420  ;;  %v1467_v20 = vmul.f32 %v2530_v0, %v1243_v41  ;;  %v1482_v1 = vmul.f32 %v2534_v26, %v1258_v62  ;;  %v1257_v3 = vld [vmem:[%s2560_s16 + $0xe0] sm:$0xff]  ;;  %v1254_v21 = vld [vmem:[%s2560_s16 + $0xc8] sm:$0xff] }
 0x245   : > { %v2103_v13 = vpop.eup %2102  ;;  %1135 = vmatpush1.msra.mxu1 %v1088_v55  ;;  %v1064_v58 = vadd.f32 1.0, %v2101_v8  ;;  %v1082_v32 = vmul.f32 %v1066_v17, %v1018_v22  ;;  %v1466_v0 = vmul.f32 %v2536_v30, %v1242_v2  ;;  %v1481_v26 = vmul.f32 %v2538_v38, %v1257_v3  ;;  %v1241_v55 = vld [vmem:[%s2560_s16 + $0x60] sm:$0xff]  ;;  %v1255_v17 = vld [vmem:[%s2560_s16 + $0xd0] sm:$0xff]  ;;  %v1238_v22 = vld [vmem:[%s2560_s16 + $0x48] sm:$0xff] }
 0x246   : > { %v2105_v19 = vpop.eup %2104  ;;  %1136 = vmatprep.subr.mxu1 %v1087_v51  ;;  %v1063_v29 = vadd.f32 1.0, %v2103_v13  ;;  %v1081_v33 = vmul.f32 %v1065_v9, %v1017_v50  ;;  %v1341_v15 = vpop.permute.xlu1 %1340  ;;  %v442_v51 = vld [vmem:[%s2706_s7 + $0x18] sm:$0xff]  ;;  %v1465_v30 = vmul.f32 %v2542_v57, %v1241_v55  ;;  %v1480_v59 = vmul.f32 %v2547_v61, %v1256_v10  ;;  %v444_v9 = vld [vmem:[%s2706_s7 + $0x28] sm:$0xff]  ;;  %v1249_v49 = vld [vmem:[%s2560_s16 + $0xa0] sm:$0xff] }
 0x247   : > { %v2107_v11 = vpop.eup %2106  ;;  %1137 = vmatpush1.msra.mxu1 %v1086_v18  ;;  %v1062_v31 = vadd.f32 1.0, %v2105_v19  ;;  %v1080_v14 = vmul.f32 %v1064_v58, %v1016_v52  ;;  %v1240_v13 = vld [vmem:[%s2560_s16 + $0x58] sm:$0xff]  ;;  %v1479_v61 = vmul.f32 %v2563_v34, %v1255_v17  ;;  %v1239_v19 = vld [vmem:[%s2560_s16 + $0x50] sm:$0xff]  ;;  %v1478_v58 = vmul.f32 %v1421_v53, %v1254_v21  ;;  %v1237_v52 = vld [vmem:[%s2560_s16 + $0x40] sm:$0xff] }
 0x248   : > { %v2109_v24 = vpop.eup %2108  ;;  %1138 = vmatprep.subr.mxu1 %v1085_v54  ;;  %v1061_v12 = vadd.f32 1.0, %v2107_v11  ;;  %v1079_v39 = vmul.f32 %v1063_v29, %v1015_v56  ;;  %v1416_v60 = vpop.permute.xlu0 %1415  ;;  %v1464_v57 = vmul.f32 %v2552_v27, %v1240_v13  ;;  %v1463_v11 = vmul.f32 %v2570_v47, %v1239_v19  ;;  %v445_v27 = vld [vmem:[%s2706_s7 + $0x30] sm:$0xff]  ;;  %v1248_v53 = vld [vmem:[%s2560_s16 + $0x98] sm:$0xff]  ;;  %v1229_v13 = vld [vmem:[%s2560_s16] sm:$0xff] }
 0x249   : > { %1139 = vmatpush1.msra.mxu1 %v1084_v23  ;;  %v1060_v35 = vadd.f32 1.0, %v2109_v24  ;;  %v1078_v16 = vmul.f32 %v1062_v31, %v1014_v36  ;;  %v1253_v24 = vld [vmem:[%s2560_s16 + $0xc0] sm:$0xff]  ;;  %v1462_v50 = vmul.f32 %v1341_v15, %v1238_v22  ;;  %v1252_v31 = vld [vmem:[%s2560_s16 + $0xb8] sm:$0xff] }
 0x24a   : > { %1140 = vmatprep.subr.mxu1 %v1083_v28  ;;  %v1077_v48 = vmul.f32 %v1061_v12, %v1013_v37  ;;  %v1336_v8 = vpop.permute.xlu1 %1335  ;;  %v1477_v29 = vmul.f32 %v1416_v60, %v1253_v24  ;;  %v1231_v60 = vld [vmem:[%s2560_s16 + $0x10] sm:$0xff] }
 0x24b   : > { %1141 = vmatpush1.msra.mxu1 %v1082_v32  ;;  %v1076_v46 = vmul.f32 %v1060_v35, %v1012_v42  ;;  %v446_v32 = vld [vmem:[%s2706_s7 + $0x38] sm:$0xff]  ;;  %v1461_v12 = vmul.f32 %v1336_v8, %v1237_v52  ;;  %v1250_v42 = vld [vmem:[%s2560_s16 + $0xa8] sm:$0xff] }
 0x24c   : > { %1142 = vmatprep.subr.mxu1 %v1081_v33  ;;  %v1411_v38 = vpop.permute.xlu0 %1410  ;;  %v447_v33 = vld [vmem:[%s2707_s8] sm:$0xff]  ;;  %v1236_v35 = vld [vmem:[%s2560_s16 + $0x38] sm:$0xff]  ;;  %v1230_v8 = vld [vmem:[%s2560_s16 + $0x8] sm:$0xff] }
 0x24d   : > { %1143 = vmatpush1.msra.mxu1 %v1080_v14  ;;  %v1476_v34 = vmul.f32 %v1411_v38, %v1252_v31 }
 0x24e   : > { %1144 = vmatprep.subr.mxu1 %v1079_v39  ;;  %v1331_v18 = vpop.permute.xlu1 %1330  ;;  %v1235_v39 = vld [vmem:[%s2560_s16 + $0x30] sm:$0xff] }
 0x24f   : > { %1145 = vmatpush1.msra.mxu1 %v1078_v16  ;;  %v1460_v36 = vmul.f32 %v1331_v18, %v1236_v35 }
 0x250   : > { %1146 = vmatprep.subr.mxu1 %v1077_v48  ;;  %v1406_v54 = vpop.permute.xlu0 %1405  ;;  %v1234_v48 = vld [vmem:[%s2560_s16 + $0x28] sm:$0xff] }
 0x251   : > { %1147 = vmatpush1.msra.mxu1 %v1076_v46 }
 0x252   : > { %1984 = vmatprep.subr.msk.mxu1 %vm1485_vm2, %v1484_v4  ;;  %1893 = vmatmul.mubr.msk.f32.vlgmr.msra.gmra.mxu1 %vm874_vm1, %v439_v63  ;;  %v1326_v23 = vpop.permute.xlu1 %1325 }
 0x253   : > { %1985 = vmatpush3.xpose.msk.msra.mxu1 %vm1485_vm2, %v1468_v6  ;;  %1186 = vmatprep.mubr.f32.mxu1 %v2119_v25  ;;  %v1459_v16 = vmul.f32 %v1326_v23, %v1235_v39  ;;  %v1233_v6 = vld [vmem:[%s2560_s16 + $0x20] sm:$0xff] }
 0x254   : > { %1986 = vmatprep.subr.msk.mxu1 %vm1485_vm2, %v1483_v45  ;;  %v1401_v28 = vpop.permute.xlu0 %1400 }
 0x255   : > { %v1474_v47 = vmul.f32 %v1401_v28, %v1250_v42 }
 0x256   : > { %1894 = vmatmul.mubr.msk.f32.gmra.mxu1 %vm874_vm1, %v440_v7  ;;  %v1321_v56 = vpop.permute.xlu1 %1320  ;;  %v1232_v7 = vld [vmem:[%s2560_s16 + $0x18] sm:$0xff] }
 0x257   : > { %1987 = vmatpush3.xpose.msk.msra.mxu1 %vm1485_vm2, %v1467_v20  ;;  %1192 = vmatprep.mubr.f32.mxu1 %v2119_v25  ;;  %v1458_v63 = vmul.f32 %v1321_v56, %v1234_v48  ;;  %v1247_v20 = vld [vmem:[%s2560_s16 + $0x90] sm:$0xff] }
 0x258   : > { %1988 = vmatprep.subr.msk.mxu1 %vm1485_vm2, %v1482_v1  ;;  %v1396_v14 = vpop.permute.xlu0 %1395 }
 0x259   : > { %v1473_v4 = vmul.f32 %v1396_v14, %v1249_v49 }
 0x25a   : > { %1895 = vmatmul.mubr.msk.f32.gmra.mxu1 %vm874_vm1, %v441_v5  ;;  %v1316_v40 = vpop.permute.xlu1 %1315  ;;  %v1246_v5 = vld [vmem:[%s2560_s16 + $0x88] sm:$0xff] }
 0x25b   : > { %1989 = vmatpush3.xpose.msk.msra.mxu1 %vm1485_vm2, %v1466_v0  ;;  %1198 = vmatprep.mubr.f32.mxu1 %v2119_v25  ;;  %v1457_v41 = vmul.f32 %v1316_v40, %v1233_v6 }
 0x25c   : > { %1990 = vmatprep.subr.msk.mxu1 %vm1485_vm2, %v1481_v26  ;;  %v1391_v43 = vpop.permute.xlu0 %1390 }
 0x25d   : > { %v1472_v62 = vmul.f32 %v1391_v43, %v1248_v53 }
 0x25e   : > { %1896 = vmatmul.mubr.msk.f32.gmra.mxu1 %vm874_vm1, %v442_v51  ;;  %v1311_v46 = vpop.permute.xlu1 %1310  ;;  %v1245_v51 = vld [vmem:[%s2560_s16 + $0x80] sm:$0xff] }
 0x25f   : > { %1991 = vmatpush3.xpose.msk.msra.mxu1 %vm1485_vm2, %v1465_v30  ;;  %1204 = vmatprep.mubr.f32.mxu1 %v2119_v25  ;;  %v1456_v1 = vmul.f32 %v1311_v46, %v1232_v7 }
 0x260   : > { %1992 = vmatprep.subr.msk.mxu1 %vm1485_vm2, %v1480_v59  ;;  %v1386_v45 = vpop.permute.xlu0 %1385 }
 0x261   : > { %v1471_v3 = vmul.f32 %v1386_v45, %v1247_v20 }
 0x262   : > { %1897 = vmatmul.mubr.msk.f32.gmra.mxu1 %vm874_vm1, %v443_v44  ;;  %v1306_v15 = vpop.permute.xlu1 %1305 }
 0x263   : > { %1993 = vmatpush3.xpose.msk.msra.mxu1 %vm1485_vm2, %v1464_v57  ;;  %1210 = vmatprep.mubr.f32.mxu1 %v2119_v25  ;;  %v1455_v26 = vmul.f32 %v1306_v15, %v1231_v60 }
 0x264   : > { %1994 = vmatprep.subr.msk.mxu1 %vm1485_vm2, %v1479_v61  ;;  %v1381_v2 = vpop.permute.xlu0 %1380 }
 0x265   : > { %v1470_v55 = vmul.f32 %v1381_v2, %v1246_v5 }
 0x266   : > { %1898 = vmatmul.mubr.msk.f32.gmra.mxu1 %vm874_vm1, %v444_v9  ;;  %v1301_v0 = vpop.permute.xlu1 %1300 }
 0x267   : > { %1995 = vmatpush3.xpose.msk.msra.mxu1 %vm1485_vm2, %v1463_v11  ;;  %1216 = vmatprep.mubr.f32.mxu1 %v2119_v25  ;;  %v1454_v30 = vmul.f32 %v1301_v0, %v1230_v8 }
 0x268   : > { %1996 = vmatprep.subr.msk.mxu1 %vm1485_vm2, %v1478_v58  ;;  %v1376_v10 = vpop.permute.xlu0 %1375 }
 0x269   : > { %v1469_v38 = vmul.f32 %v1376_v10, %v1245_v51 }
 0x26a   : > { %1899 = vmatmul.mubr.msk.f32.gmra.mxu1 %vm874_vm1, %v445_v27  ;;  %v1296_v59 = vpop.permute.xlu1 %1295  ;;  %v1656_v27 = vlaneseq }
 0x26b   : > { %1997 = vmatpush3.xpose.msk.msra.mxu1 %vm1485_vm2, %v1462_v50  ;;  %1222 = vmatprep.mubr.f32.mxu1 %v2119_v25  ;;  %v1251_v25 = vld [vmem:[%s2560_s16 + $0xb0] sm:$0xff]  ;;  %v1453_v17 = vmul.f32 %v1296_v59, %v1229_v13  ;;  %s1843_s16 = sshll.u32 %s1832_s14, 1 }
 0x26c   : > { %1998 = vmatprep.subr.msk.mxu1 %vm1485_vm2, %v1477_v29  ;;  %v1475_v37 = vmul.f32 %v1406_v54, %v1251_v25  ;;  %v1657_v28 = vshrl.u32 %v1656_v27, 7  ;;  %p402_p4 = scmp.lt.s32.totalorder %s1843_s16, 3 }
 0x26e   : > { %1900 = vmatmul.mubr.msk.f32.gmra.mxu1 %vm874_vm1, %v446_v32  ;;  %v1658_v52 = vsub.s32 0, %v1657_v28  ;;  %v1668_v31 = vsub.s32 1, %v1657_v28  ;;  %v1680_v32 = vsub.s32 2, %v1657_v28  ;;  %v1716_v39 = vsub.s32 5, %v1657_v28  ;;  %s2713_s16 = smov (!%p402_p4, %s1843_s16), 3 }
 0x26f   : > { %1999 = vmatpush3.xpose.msk.msra.mxu1 %vm1485_vm2, %v1461_v12  ;;  %2016 = vmatprep.mubr.msk.f32.mxu1 %vm1485_vm2, %v447_v33  ;;  %v1728_v46 = vsub.s32 6, %v1657_v28  ;;  %s1844_s14 = sshll.u32 %s2713_s16, 3 }
 0x270   : > { %2000 = vmatprep.subr.msk.mxu1 %vm1485_vm2, %v1476_v34  ;;  %v1704_v34 = vsub.s32 4, %v1657_v28  ;;  %s405_s18 = scalar_lea.vmem %s2709_s10, %s1844_s14 }
 0x273   : > { %2001 = vmatpush3.xpose.msk.msra.mxu1 %vm1485_vm2, %v1460_v36 }
 0x274   : > { %2002 = vmatprep.subr.msk.mxu1 %vm1485_vm2, %v1475_v37 }
 0x277   : > { %2003 = vmatpush3.xpose.msk.msra.mxu1 %vm1485_vm2, %v1459_v16 }
 0x278   : > { %2004 = vmatprep.subr.msk.mxu1 %vm1485_vm2, %v1474_v47 }
 0x27b   : > { %2005 = vmatpush3.xpose.msk.msra.mxu1 %vm1485_vm2, %v1458_v63 }
 0x27c   : > { %2006 = vmatprep.subr.msk.mxu1 %vm1485_vm2, %v1473_v4 }
 0x27f   : > { %2007 = vmatpush3.xpose.msk.msra.mxu1 %vm1485_vm2, %v1457_v41 }
 0x280   : > { %2008 = vmatprep.subr.msk.mxu1 %vm1485_vm2, %v1472_v62  ;;  %v1740_v62 = vsub.s32 7, %v1657_v28 }
 0x283   : > { %2009 = vmatpush3.xpose.msk.msra.mxu1 %vm1485_vm2, %v1456_v1 }
 0x284   : > { %2010 = vmatprep.subr.msk.mxu1 %vm1485_vm2, %v1471_v3 }
 0x287   : > { %2011 = vmatpush3.xpose.msk.msra.mxu1 %vm1485_vm2, %v1455_v26 }
 0x288   : > { %2012 = vmatprep.subr.msk.mxu1 %vm1485_vm2, %v1470_v55 }
 0x28b   : > { %2013 = vmatpush3.xpose.msk.msra.mxu1 %vm1485_vm2, %v1454_v30 }
 0x28c   : > { %2014 = vmatprep.subr.msk.mxu1 %vm1485_vm2, %v1469_v38 }
 0x28f   : > { %2015 = vmatpush3.xpose.msk.msra.mxu1 %vm1485_vm2, %v1453_v17 }
 0x292   : > { %2017 = vmatmul.mubr.msk.f32.vlgmr.msra.gmra.mxu1 %vm1485_vm2, %v447_v33  ;;  %v1692_v33 = vsub.s32 3, %v1657_v28 }
 0x312   : > { %v1182_v44 = vpop.f32.mrf.mxu1 }
 0x314   : > { %v1184_v18 = vpop.f32.mrf.mxu1 }
 0x316   : > { %v1188_v57 = vpop.f32.mrf.mxu1 }
 0x318   : > { %v1190_v61 = vpop.f32.mrf.mxu1 }
 0x31a   : > { %v1194_v19 = vpop.f32.mrf.mxu1 }
 0x31c   : > { %v1196_v21 = vpop.f32.mrf.mxu1 }
 0x31e   : > { %v1200_v54 = vpop.f32.mrf.mxu1 }
 0x320   : > { %v1202_v9 = vpop.f32.mrf.mxu1 }
 0x322   : > { %v1206_v11 = vpop.f32.mrf.mxu1 }
 0x324   : > { %v1208_v58 = vpop.f32.mrf.mxu1 }
 0x326   : > { %v1212_v22 = vpop.f32.mrf.mxu1 }
 0x328   : > { %v1214_v23 = vpop.f32.mrf.mxu1 }
 0x32a   : > { %v1218_v24 = vpop.f32.mrf.mxu1 }
 0x32c   : > { %v1220_v50 = vpop.f32.mrf.mxu1 }
 0x32e   : > { %v1224_v29 = vpop.f32.mrf.mxu1 }
 0x330   : > { %v1226_v56 = vpop.f32.mrf.mxu1 }
 0x352   : > { %v1651_v12 = vpop.f32.mrf.mxu1 }
 0x353   : > { %v1659_v35 = vrot.slane %v1651_v12, %v1658_v52  ;;  %v1669_v25 = vrot.slane %v1651_v12, %v1668_v31  ;;  %v1681_v14 = vrot.slane %v1651_v12, %v1680_v32  ;;  %v1693_v37 = vrot.slane %v1651_v12, %v1692_v33 }
 0x354   : > { %v1653_v36 = vpop.f32.mrf.mxu1  ;;  %v1705_v49 = vrot.slane %v1651_v12, %v1704_v34  ;;  %v1717_v41 = vrot.slane %v1651_v12, %v1716_v39  ;;  %v1729_v3 = vrot.slane %v1651_v12, %v1728_v46  ;;  %v1741_v8 = vrot.slane %v1651_v12, %v1740_v62 }
 0x355   : > { %v1663_v40 = vrot.slane %v1653_v36, %v1658_v52  ;;  %v1664_v42 = vmul.f32 %v1659_v35, %v1182_v44  ;;  %v1673_v16 = vrot.slane %v1653_v36, %v1668_v31  ;;  %v1674_v43 = vmul.f32 %v1669_v25, %v1188_v57 }
 0x356   : > { %v1685_v47 = vrot.slane %v1653_v36, %v1680_v32  ;;  %v1686_v48 = vmul.f32 %v1681_v14, %v1194_v19  ;;  %v1697_v53 = vrot.slane %v1653_v36, %v1692_v33  ;;  %v1709_v45 = vrot.slane %v1653_v36, %v1704_v34 }
 0x357   : > { %v1665_v63 = vmul.f32 %v1663_v40, %v1184_v18  ;;  %v1675_v4 = vmul.f32 %v1673_v16, %v1190_v61  ;;  %v1676_v6 = vadd.f32 %v1674_v43, %v1664_v42  ;;  %v1698_v1 = vmul.f32 %v1693_v37, %v1200_v54 }
 0x358   : > { %v1687_v15 = vmul.f32 %v1685_v47, %v1196_v21  ;;  %v1721_v2 = vrot.slane %v1653_v36, %v1716_v39  ;;  %v1699_v5 = vmul.f32 %v1697_v53, %v1202_v9  ;;  %v1710_v26 = vmul.f32 %v1705_v49, %v1206_v11 }
 0x359   : > { %v1677_v7 = vadd.f32 %v1675_v4, %v1665_v63  ;;  %v1688_v20 = vadd.f32 %v1686_v48, %v1676_v6  ;;  %v1711_v55 = vmul.f32 %v1709_v45, %v1208_v58  ;;  %v1722_v30 = vmul.f32 %v1717_v41, %v1212_v22 }
 0x35a   : > { %v1733_v38 = vrot.slane %v1653_v36, %v1728_v46  ;;  %v1723_v59 = vmul.f32 %v1721_v2, %v1214_v23  ;;  %v1734_v44 = vmul.f32 %v1729_v3, %v1218_v24  ;;  %v1745_v18 = vrot.slane %v1653_v36, %v1740_v62 }
 0x35b   : > { %v1689_v60 = vadd.f32 %v1687_v15, %v1677_v7  ;;  %v1700_v0 = vadd.f32 %v1698_v1, %v1688_v20  ;;  %v1746_v21 = vmul.f32 %v1741_v8, %v1224_v29 }
 0x35c   : > { %v1735_v61 = vmul.f32 %v1733_v38, %v1220_v50  ;;  %v1747_v9 = vmul.f32 %v1745_v18, %v1226_v56 }
 0x35d   : > { %v1701_v10 = vadd.f32 %v1699_v5, %v1689_v60  ;;  %v1712_v51 = vadd.f32 %v1710_v26, %v1700_v0 }
 0x35f   : > { %v1713_v13 = vadd.f32 %v1711_v55, %v1701_v10  ;;  %v1724_v17 = vadd.f32 %v1722_v30, %v1712_v51 }
 0x361   : > { %v1725_v57 = vadd.f32 %v1723_v59, %v1713_v13  ;;  %v1736_v19 = vadd.f32 %v1734_v44, %v1724_v17 }
 0x363   : > { %v1737_v54 = vadd.f32 %v1735_v61, %v1725_v57  ;;  %v1748_v11 = vadd.f32 %v1746_v21, %v1736_v19 }
 0x365   : > { %v1749_v58 = vadd.f32 %v1747_v9, %v1737_v54  ;;  %1750 = vst [vmem:[%s405_s18] sm:$0xff] %v1748_v11 }
 0x367   : > { %1751 = vst [vmem:[%s405_s18 + $0x8] sm:$0xff] %v1749_v58 }
 0x368 PF: > { %s20_s13 = sadd.s32 1, %s2116_s13  }
 0x369   : > { %p17_p5 = scmp.ge.s32.totalorder %s20_s13, 4  }
 0x36b   :  { %19 = sbr.rel (!%p17_p5) target bundleno = 1 (0x1), region = 96 }

</bundles_post_ra>
